<compile_context>
chip_gen: v6e
topology: v6e:2x2x1
jax: 0.10.0
libtpu: 0.0.40
codegen_flags: <defaults>
</compile_context>

<pallas_src>
import jax
import jax.numpy as jnp
from jax.experimental import pallas as pl
from jax.experimental.pallas import tpu as pltpu


def _detect_vmem_limit():
    # v5e / v6e: 128 MiB physical VMEM -> 64 MiB scoped is comfortable.
    # v7x: only 64 MiB physical -> stay conservative (<= ~48 MiB).
    try:
        kind = jax.devices()[0].device_kind.lower()
    except Exception:
        kind = ""
    if "v5" in kind or "v6" in kind:
        return 64 * 1024 * 1024
    return 48 * 1024 * 1024


_VMEM_LIMIT = _detect_vmem_limit()


# ----------------------------------------------------------------------------
# Pallas kernels: linear layer  y = x @ W^T (+ b)
# Row-tiled, output-feature tiled, compute_dtype MXU operands, f32 accumulate.
# ----------------------------------------------------------------------------
def _linear_bias_kernel(x_ref, wt_ref, b_ref, o_ref):
    acc = jnp.dot(x_ref[...], wt_ref[...], preferred_element_type=jnp.float32)
    o_ref[...] = (acc + b_ref[...]).astype(o_ref.dtype)


def _linear_nobias_kernel(x_ref, wt_ref, o_ref):
    o_ref[...] = jnp.dot(x_ref[...], wt_ref[...],
                         preferred_element_type=jnp.float32).astype(o_ref.dtype)


def linear_pallas(x, w, bias=None, *, compute_dtype=jnp.float32,
                  out_dtype=jnp.float32, block_rows=512, block_cols=2048):
    # x: (N, in), w: (out, in) (torch nn.Linear convention), bias: (out,)|None
    n, e_in = x.shape
    e_out = w.shape[0]
    x = x.astype(compute_dtype)                 # MXU operand dtype (bf16/f32)
    wt = jnp.asarray(w, compute_dtype).T        # (in, out)

    tm = min(block_rows, n)
    if tm < n:
        tm = max(8, (tm // 8) * 8)              # sublane-aligned row tile
    # Tile the output-feature axis so a large weight never monopolizes VMEM
    # (matters on v7x's 64 MiB); single block when e_out is small.
    tn = block_cols if (e_out > block_cols and e_out % block_cols == 0) else e_out
    grid = (pl.cdiv(n, tm), e_out // tn)

    x_spec = pl.BlockSpec((tm, e_in), lambda i, j: (i, 0))
    w_spec = pl.BlockSpec((e_in, tn), lambda i, j: (0, j))
    o_spec = pl.BlockSpec((tm, tn), lambda i, j: (i, j))
    cparams = pltpu.CompilerParams(
        dimension_semantics=("parallel", "parallel"),
        vmem_limit_bytes=_VMEM_LIMIT)
    out_shape = jax.ShapeDtypeStruct((n, e_out), out_dtype)

    if bias is None:                            # no zero-bias DMA / add
        return pl.pallas_call(
            _linear_nobias_kernel, out_shape=out_shape, grid=grid,
            in_specs=[x_spec, w_spec], out_specs=o_spec,
            compiler_params=cparams)(x, wt)

    b2d = jnp.asarray(bias, jnp.float32).reshape(1, e_out)
    b_spec = pl.BlockSpec((1, tn), lambda i, j: (0, j))
    return pl.pallas_call(
        _linear_bias_kernel, out_shape=out_shape, grid=grid,
        in_specs=[x_spec, w_spec, b_spec], out_specs=o_spec,
        compiler_params=cparams)(x, wt, b2d)


def linear_ref(x, w, bias=None, *, compute_dtype=jnp.float32,
               out_dtype=jnp.float32):
    y = jnp.dot(x.astype(compute_dtype), jnp.asarray(w, compute_dtype).T,
                preferred_element_type=jnp.float32)
    if bias is not None:
        y = y + jnp.asarray(bias, jnp.float32)
    return y.astype(out_dtype)


# ----------------------------------------------------------------------------
# Pallas kernel: G LSH buckets of one (batch*head) row per grid step.
# Fuses key unit-length normalisation + look_one_back (previous single bucket
# fetched through a tiny (1,1,m,d) BlockSpec), diagonal/position self-masks,
# single-exp softmax and the two probs@V matmuls.  Emits per-row logsumexp for
# multi-hash combining.
# ----------------------------------------------------------------------------
def _lsh_chunk_attn_kernel(qk_c_ref, qk_p_ref, v_c_ref, v_p_ref,
                           qt_ref, kt_ref, ktp_ref, o_ref, lse_ref):
    G, m, d = qk_c_ref.shape[1], qk_c_ref.shape[2], qk_c_ref.shape[3]
    f32 = jnp.float32

    qk_c = qk_c_ref[0]                       # (G, m, d) current buckets (cdt)
    v_c = v_c_ref[0]                         # (G, m, d)
    qk_pb = qk_p_ref[0]                      # (1, m, d) single previous bucket
    v_pb = v_p_ref[0]                        # (1, m, d)
    cdt = qk_c.dtype                         # MXU operand dtype (bf16 / f32)

    def unit_length(z):                      # make_unit_length, f32 math
        zf = z.astype(f32)
        return zf / (jnp.sqrt(jnp.sum(zf * zf, axis=-1, keepdims=True)) + 1e-6)

    # Fold the softmax scale into q: one (G,m,d) multiply instead of two
    # (G,m,m) multiplies on the dots (VPU is the contended slot here).
    q = qk_c * (d ** -0.5)

    k_c = unit_length(qk_c).astype(cdt)
    k_pb = unit_length(qk_pb).astype(cdt)
    if G > 1:
        # look_one_back: previous bucket of bucket g is bucket g-1 of this
        # block for g>0, and the separately-fetched single bucket for g=0.
        k_p = jnp.concatenate([k_pb, k_c[:G - 1]], axis=0)              # (G,m,d)
        v_p = jnp.concatenate([v_pb, v_c[:G - 1]], axis=0)
        ktp = jnp.concatenate([ktp_ref[0], kt_ref[0, :G - 1]], axis=0)  # (G,1,m)
    else:
        k_p, v_p, ktp = k_pb, v_pb, ktp_ref[0]

    # q @ k^T for the two key halves (contract d, batch over G), f32 accum
    dn_qk = (((2,), (2,)), ((0,), (0,)))
    dots_c = jax.lax.dot_general(q, k_c, dn_qk, preferred_element_type=f32)
    dots_p = jax.lax.dot_general(q, k_p, dn_qk, preferred_element_type=f32)

    neg = f32(-1e5)
    # Current half self-mask: a bucket never crosses a hash-round boundary, so
    # positions inside it are unique and "same position" == the diagonal.
    rows = jax.lax.broadcasted_iota(jnp.int32, (1, m, m), 1)
    cols = jax.lax.broadcasted_iota(jnp.int32, (1, m, m), 2)
    dots_c = jnp.where(rows == cols, neg, dots_c)
    # Previous half: real position compare (collisions only at round borders).
    dots_p = jnp.where(qt_ref[0] == ktp, neg, dots_p)

    # single-exp softmax over the (implicitly concatenated) 2m key axis
    max_d = jnp.maximum(jnp.max(dots_c, axis=-1, keepdims=True),
                        jnp.max(dots_p, axis=-1, keepdims=True))     # (G, m, 1)
    e_c = jnp.exp(dots_c - max_d)
    e_p = jnp.exp(dots_p - max_d)
    s = (jnp.sum(e_c, axis=-1, keepdims=True)
         + jnp.sum(e_p, axis=-1, keepdims=True))                     # (G, m, 1)
    if cdt == jnp.float32:
        inv = 1.0 / s                        # keep strict f32 parity
    else:
        inv = pl.reciprocal(s, approx=True)  # EUP vrcp, off the VALU path
    p_c = (e_c * inv).astype(cdt)
    p_p = (e_p * inv).astype(cdt)

    # probs @ v for the two halves (contract keys, batch over G), f32 accum
    dn_pv = (((2,), (1,)), ((0,), (0,)))
    out = (jax.lax.dot_general(p_c, v_c, dn_pv, preferred_element_type=f32)
           + jax.lax.dot_general(p_p, v_p, dn_pv, preferred_element_type=f32))
    o_ref[0] = out
    # TODO(synk): with d < 128 the (m, d) stores are lane-masked; a lane-dense
    # (m*d) writeback would need an in-kernel relayout, skipped here.
    lse_ref[0] = max_d + jnp.log(s)


def _pick_group_size(C, m, d, itemsize, cap, vmem_budget):
    # Rough per-grid-step VMEM: double-buffered I/O blocks plus the f32
    # softmax intermediates (dots / exp / probs for both key halves).
    def step_bytes(g):
        io = 2 * (2 * g * m * d * itemsize        # qk + v current blocks
                  + 2 * m * d * itemsize          # prev single buckets
                  + g * m * d * 4                 # f32 output block
                  + 3 * g * m * 4)                # positions + lse
        tmp = 6 * g * m * m * 4
        return io + tmp
    best = 1
    for g in range(1, min(C, cap) + 1):
        if C % g == 0 and step_bytes(g) <= vmem_budget:
            best = g
    return best


def chunk_attention_pallas(bqk, bv, bt, max_chunks_per_block=128):
    # bqk, bv: (B, C, m, d) sorted per-bucket qk / v (MXU operand dtype)
    # bt:      (B, C, m)    int32 original sequence positions
    B, C, m, d = bqk.shape
    itemsize = jnp.dtype(bqk.dtype).itemsize
    G = _pick_group_size(C, m, d, itemsize, max_chunks_per_block,
                         _VMEM_LIMIT // 2)        # headroom for double buffers
    nI = C // G

    qt = bt[:, :, :, None]                        # (B, C, m, 1) free reshape
    kt = bt[:, :, None, :]                        # (B, C, 1, m) free reshape

    cur = lambda b, i: (b, i, 0, 0)
    # Single bucket just before this block's first bucket; wraps over the full
    # C axis, matching look_one_back's wrap across the row / hash rounds.
    prev = lambda b, i: (b, (i * G + C - 1) % C, 0, 0)

    bo, lse = pl.pallas_call(
        _lsh_chunk_attn_kernel,
        out_shape=(jax.ShapeDtypeStruct((B, C, m, d), jnp.float32),
                   jax.ShapeDtypeStruct((B, C, m, 1), jnp.float32)),
        grid=(B, nI),                             # both parallel; B = b*h >= 2
        in_specs=[pl.BlockSpec((1, G, m, d), cur),    # qk (queries & keys)
                  pl.BlockSpec((1, 1, m, d), prev),   # qk, prev single bucket
                  pl.BlockSpec((1, G, m, d), cur),    # v
                  pl.BlockSpec((1, 1, m, d), prev),   # v, prev single bucket
                  pl.BlockSpec((1, G, m, 1), cur),    # query positions
                  pl.BlockSpec((1, G, 1, m), cur),    # key positions (lane)
                  pl.BlockSpec((1, 1, 1, m), prev)],  # prev bucket positions
        out_specs=(pl.BlockSpec((1, G, m, d), cur),
                   pl.BlockSpec((1, G, m, 1), cur)),
        compiler_params=pltpu.CompilerParams(
            dimension_semantics=("parallel", "parallel"),
            vmem_limit_bytes=_VMEM_LIMIT),
    )(bqk, bqk, bv, bv, qt, kt, kt)
    return bo, lse


def chunk_attention_ref(bqk, bv, bt):
    B, C, m, d = bqk.shape
    f32 = jnp.float32
    cdt = bqk.dtype

    bkf = bqk.astype(f32)
    bk = (bkf / (jnp.sqrt(jnp.sum(bkf * bkf, axis=-1, keepdims=True)) + 1e-6)
          ).astype(cdt)

    def look_one_back(z):
        extra = jnp.concatenate([z[:, -1:], z[:, :-1]], axis=1)
        return jnp.concatenate([z, extra], axis=2)

    bk2 = look_one_back(bk)                                   # (B, C, 2m, d)
    bv2 = look_one_back(bv)
    bt_extra = jnp.concatenate([bt[:, -1:], bt[:, :-1]], axis=1)
    bkvt = jnp.concatenate([bt, bt_extra], axis=2)            # (B, C, 2m)

    dots = jnp.einsum('bcie,bcje->bcij', bqk, bk2,
                      preferred_element_type=f32) * (d ** -0.5)
    mask = bt[:, :, :, None] == bkvt[:, :, None, :]
    dots = jnp.where(mask, f32(-1e5), dots)

    max_d = jnp.max(dots, axis=-1, keepdims=True)
    e = jnp.exp(dots - max_d)
    s = jnp.sum(e, axis=-1, keepdims=True)
    probs = (e * (1.0 / s)).astype(cdt)
    bo = jnp.einsum('bcij,bcje->bcie', probs, bv2,
                    preferred_element_type=f32)
    lse = max_d + jnp.log(s)                                  # (B, C, m, 1)
    return bo, lse


# ----------------------------------------------------------------------------
# LSHAttention forward (defaults: causal=False, attend_across_buckets=True,
# allow_duplicate_attention=True, dropout=0)
# ----------------------------------------------------------------------------
def lsh_attention(qk, v, rotations, bucket_size, n_hashes, use_pallas=True,
                  compute_dtype=jnp.float32, max_chunks_per_block=128):
    B, T, d = qk.shape
    n_buckets = T // bucket_size

    # --- hash_vectors (rotations shared across batch; rotations_per_head=False)
    rotated = jnp.einsum('btf,fhi->bhti', qk, rotations)      # (B, H, T, nb/2)
    rotated = jnp.concatenate([rotated, -rotated], axis=-1)   # (B, H, T, nb)
    buckets = jnp.argmax(rotated, axis=-1).astype(jnp.int32)  # (B, H, T)
    offsets = (jnp.arange(n_hashes, dtype=jnp.int32) * n_buckets).reshape(1, -1, 1)
    buckets = (buckets + offsets).reshape(B, n_hashes * T)

    # --- sort by (bucket, position) -----------------------------------------
    ticker = jnp.arange(n_hashes * T, dtype=jnp.int32)[None, :]
    buckets_and_t = T * buckets + (ticker % T)
    sticker = jnp.argsort(buckets_and_t, axis=-1).astype(jnp.int32)
    undo_sort = jnp.argsort(sticker, axis=-1).astype(jnp.int32)
    st = (sticker % T).astype(jnp.int32)

    sqk = jnp.take_along_axis(qk, st[:, :, None], axis=1)     # (B, H*T, d)
    sv = jnp.take_along_axis(v, st[:, :, None], axis=1)

    C = n_hashes * n_buckets
    m = bucket_size
    bqk = sqk.reshape(B, C, m, d).astype(compute_dtype)
    bv = sv.reshape(B, C, m, d).astype(compute_dtype)
    bt = st.reshape(B, C, m)

    if use_pallas:
        bo, lse = chunk_attention_pallas(bqk, bv, bt, max_chunks_per_block)
    else:
        bo, lse = chunk_attention_ref(bqk, bv, bt)

    so = bo.reshape(B, n_hashes * T, d)
    slogits = lse.reshape(B, n_hashes * T)

    # --- unsort and combine hash rounds -------------------------------------
    o = jnp.take_along_axis(so, undo_sort[:, :, None], axis=1)
    logits = jnp.take_along_axis(slogits, undo_sort, axis=1)

    if n_hashes == 1:
        out = o
    else:
        o = o.reshape(B, n_hashes, T, d)
        logits = logits.reshape(B, n_hashes, T, 1)
        probs = jnp.exp(logits - jax.nn.logsumexp(logits, axis=1, keepdims=True))
        out = jnp.sum(o * probs, axis=1)
    return out, buckets


# ----------------------------------------------------------------------------
# LSHSelfAttention forward
# ----------------------------------------------------------------------------
def lsh_self_attention(x, params, heads, bucket_size, n_hashes,
                       use_pallas=True, compute_dtype=jnp.float32):
    b, t, e = x.shape
    h = heads
    dh = e // h
    lin = linear_pallas if use_pallas else linear_ref

    x2d = x.reshape(b * t, e)
    # qk/v projections: compute_dtype MXU operands AND outputs (halves the
    # projection writeback and the downstream sort/gather traffic when bf16).
    qk = lin(x2d, params['w_qk'], compute_dtype=compute_dtype,
             out_dtype=compute_dtype).reshape(b, t, e)
    v = lin(x2d, params['w_v'], compute_dtype=compute_dtype,
            out_dtype=compute_dtype).reshape(b, t, e)

    def merge_heads(z):
        return z.reshape(b, t, h, dh).transpose(0, 2, 1, 3).reshape(b * h, t, dh)

    qkm = merge_heads(qk)
    vm = merge_heads(v)

    # attn_chunks split of the (b*h) batch is semantically a no-op here since
    # the random rotations are a single shared (deterministic) parameter.
    attn_out, _ = lsh_attention(qkm, vm, params['rotations'], bucket_size,
                                n_hashes, use_pallas=use_pallas,
                                compute_dtype=compute_dtype)

    out = attn_out.reshape(b, h, t, dh).transpose(0, 2, 1, 3).reshape(b, t, e)
    out = lin(out.reshape(b * t, e), params['w_out'], params['b_out'],
              compute_dtype=compute_dtype,
              out_dtype=jnp.float32).reshape(b, t, e)
    return out


# ----------------------------------------------------------------------------
if __name__ == "__main__":
    b, t, emb, heads = 2, 16, 32, 4
    bucket_size, n_hashes = 4, 2
    d = emb // heads
    n_buckets = t // bucket_size
    assert t % bucket_size == 0 and n_buckets % 2 == 0

    key = jax.random.PRNGKey(0)
    kx, kqk, kv, ko, kb, kr = jax.random.split(key, 6)
    x = jax.random.normal(kx, (b, t, emb), jnp.float32)
    params = {
        'w_qk': jax.random.normal(kqk, (emb, emb), jnp.float32) * (emb ** -0.5),
        'w_v': jax.random.normal(kv, (emb, emb), jnp.float32) * (emb ** -0.5),
        'w_out': jax.random.normal(ko, (emb, emb), jnp.float32) * (emb ** -0.5),
        'b_out': jax.random.normal(kb, (emb,), jnp.float32) * 0.01,
        # TODO(synk): the PyTorch module draws fresh torch.randn rotations per
        # forward (and per attn_chunk); here they are a deterministic shared
        # parameter, which keeps the rest of the forward pass identical.
        'rotations': jax.random.normal(kr, (d, n_hashes, n_buckets // 2),
                                       jnp.float32),
    }

    fwd = jax.jit(lsh_self_attention,
                  static_argnames=("heads", "bucket_size", "n_hashes",
                                   "use_pallas", "compute_dtype"))

    # 1) strict f32 path: Pallas vs pure-JAX reference (module semantics)
    out32 = fwd(x, params, heads=heads, bucket_size=bucket_size,
                n_hashes=n_hashes, use_pallas=True, compute_dtype=jnp.float32)
    ref32 = fwd(x, params, heads=heads, bucket_size=bucket_size,
                n_hashes=n_hashes, use_pallas=False, compute_dtype=jnp.float32)
    out32, ref32 = jax.block_until_ready((out32, ref32))
    assert out32.shape == (b, t, emb)
    err32 = float(jnp.max(jnp.abs(out32 - ref32)))
    assert err32 < 1e-4, f"f32 path max abs error {err32}"

    # 2) bf16-MXU-operand fast path (v6e/v7x friendly): Pallas vs a reference
    #    applying the same operand casts (softmax / lse / accum stay f32).
    #    Tolerance is bf16-scale: the kernel additionally folds the softmax
    #    scale into q and uses the EUP approximate reciprocal.
    out16 = fwd(x, params, heads=heads, bucket_size=bucket_size,
                n_hashes=n_hashes, use_pallas=True, compute_dtype=jnp.bfloat16)
    ref16 = fwd(x, params, heads=heads, bucket_size=bucket_size,
                n_hashes=n_hashes, use_pallas=False, compute_dtype=jnp.bfloat16)
    out16, ref16 = jax.block_until_ready((out16, ref16))
    err16 = float(jnp.max(jnp.abs(out16 - ref16)))
    assert err16 < 5e-2, f"bf16 path max abs error {err16}"

    print("KERNEL_OK")
</pallas_src>

<mosaic_0001>
module attributes {stable_mosaic.version = 11 : i64} {
  func.func @_linear_nobias_kernel(%arg0: i32, %arg1: i32, %arg2: memref<32x32xf32, #tpu.memory_space<vmem>>, %arg3: memref<32x32xf32, #tpu.memory_space<vmem>>, %arg4: memref<32x32xf32, #tpu.memory_space<vmem>>) attributes {dimension_semantics = [#tpu.dimension_semantics<parallel>, #tpu.dimension_semantics<parallel>], iteration_bounds = array<i64: 1, 1>, scalar_prefetch = 0 : i64, scratch_operands = 0 : i64, tpu.core_type = #tpu.core_type<tc>, window_params = [{transform_indices = @transform_0, window_bounds = array<i64: 32, 32>}, {transform_indices = @transform_1, window_bounds = array<i64: 32, 32>}, {transform_indices = @transform_2, window_bounds = array<i64: 32, 32>}]} {
    %c0 = arith.constant 0 : index
    %c0_0 = arith.constant 0 : index
    %0 = vector.load %arg2[%c0, %c0_0] : memref<32x32xf32, #tpu.memory_space<vmem>>, vector<32x32xf32>
    %c0_1 = arith.constant 0 : index
    %c0_2 = arith.constant 0 : index
    %1 = vector.load %arg3[%c0_1, %c0_2] : memref<32x32xf32, #tpu.memory_space<vmem>>, vector<32x32xf32>
    %cst = arith.constant dense<0.000000e+00> : vector<32x32xf32>
    %2 = tpu.matmul %0, %1, %cst {dimension_numbers = #tpu.dot_dimension_numbers<[1], [0], [0], [1], [0, 0, 1, 1], [], []>} : vector<32x32xf32>, vector<32x32xf32>, vector<32x32xf32> -> vector<32x32xf32>
    %c0_3 = arith.constant 0 : index
    %c0_4 = arith.constant 0 : index
    %3 = vector.load %arg4[%c0_3, %c0_4] : memref<32x32xf32, #tpu.memory_space<vmem>>, vector<32x32xf32>
    tpu.vector_store %arg4[%c0_3, %c0_4], %2 {strides = array<i32>} : memref<32x32xf32, #tpu.memory_space<vmem>>, vector<32x32xf32>,
    return
  }
  func.func @transform_0(%arg0: i32, %arg1: i32) -> (i32, i32) {
    %c0_i32 = arith.constant 0 : i32
    %c0_i32_0 = arith.constant 0 : i32
    return %arg0, %c0_i32 : i32, i32
  }
  func.func @transform_1(%arg0: i32, %arg1: i32) -> (i32, i32) {
    %c0_i32 = arith.constant 0 : i32
    %c0_i32_0 = arith.constant 0 : i32
    return %c0_i32, %arg1 : i32, i32
  }
  func.func @transform_2(%arg0: i32, %arg1: i32) -> (i32, i32) {
    %c0_i32 = arith.constant 0 : i32
    return %arg0, %arg1 : i32, i32
  }
}

module attributes {stable_mosaic.version = 11 : i64} {
  func.func @_lsh_chunk_attn_kernel(%arg0: i32, %arg1: i32, %arg2: memref<1x8x4x8xf32, #tpu.memory_space<vmem>>, %arg3: memref<1x1x4x8xf32, #tpu.memory_space<vmem>>, %arg4: memref<1x8x4x8xf32, #tpu.memory_space<vmem>>, %arg5: memref<1x1x4x8xf32, #tpu.memory_space<vmem>>, %arg6: memref<1x8x4x1xi32, #tpu.memory_space<vmem>>, %arg7: memref<1x8x1x4xi32, #tpu.memory_space<vmem>>, %arg8: memref<1x1x1x4xi32, #tpu.memory_space<vmem>>, %arg9: memref<1x8x4x8xf32, #tpu.memory_space<vmem>>, %arg10: memref<1x8x4x1xf32, #tpu.memory_space<vmem>>) attributes {dimension_semantics = [#tpu.dimension_semantics<parallel>, #tpu.dimension_semantics<parallel>], iteration_bounds = array<i64: 8, 1>, scalar_prefetch = 0 : i64, scratch_operands = 0 : i64, tpu.core_type = #tpu.core_type<tc>, window_params = [{transform_indices = @transform_0, window_bounds = array<i64: 1, 8, 4, 8>}, {transform_indices = @transform_1, window_bounds = array<i64: 1, 1, 4, 8>}, {transform_indices = @transform_2, window_bounds = array<i64: 1, 8, 4, 8>}, {transform_indices = @transform_3, window_bounds = array<i64: 1, 1, 4, 8>}, {transform_indices = @transform_4, window_bounds = array<i64: 1, 8, 4, 1>}, {transform_indices = @transform_5, window_bounds = array<i64: 1, 8, 1, 4>}, {transform_indices = @transform_6, window_bounds = array<i64: 1, 1, 1, 4>}, {transform_indices = @transform_7, window_bounds = array<i64: 1, 8, 4, 8>}, {transform_indices = @transform_8, window_bounds = array<i64: 1, 8, 4, 1>}]} {
    %c0 = arith.constant 0 : index
    %c0_0 = arith.constant 0 : index
    %c0_1 = arith.constant 0 : index
    %c0_2 = arith.constant 0 : index
    %0 = vector.load %arg2[%c0, %c0_0, %c0_1, %c0_2] : memref<1x8x4x8xf32, #tpu.memory_space<vmem>>, vector<1x8x4x8xf32>
    %1 = vector.shape_cast %0 : vector<1x8x4x8xf32> to vector<8x4x8xf32>
    %c0_3 = arith.constant 0 : index
    %c0_4 = arith.constant 0 : index
    %c0_5 = arith.constant 0 : index
    %c0_6 = arith.constant 0 : index
    %2 = vector.load %arg4[%c0_3, %c0_4, %c0_5, %c0_6] : memref<1x8x4x8xf32, #tpu.memory_space<vmem>>, vector<1x8x4x8xf32>
    %3 = vector.shape_cast %2 : vector<1x8x4x8xf32> to vector<8x4x8xf32>
    %c0_7 = arith.constant 0 : index
    %c0_8 = arith.constant 0 : index
    %c0_9 = arith.constant 0 : index
    %c0_10 = arith.constant 0 : index
    %4 = vector.load %arg3[%c0_7, %c0_8, %c0_9, %c0_10] : memref<1x1x4x8xf32, #tpu.memory_space<vmem>>, vector<1x1x4x8xf32>
    %5 = vector.shape_cast %4 : vector<1x1x4x8xf32> to vector<1x4x8xf32>
    %c0_11 = arith.constant 0 : index
    %c0_12 = arith.constant 0 : index
    %c0_13 = arith.constant 0 : index
    %c0_14 = arith.constant 0 : index
    %6 = vector.load %arg5[%c0_11, %c0_12, %c0_13, %c0_14] : memref<1x1x4x8xf32, #tpu.memory_space<vmem>>, vector<1x1x4x8xf32>
    %7 = vector.shape_cast %6 : vector<1x1x4x8xf32> to vector<1x4x8xf32>
    %cst = arith.constant 0.353553385 : f32
    %8 = vector.broadcast %cst : f32 to vector<8x4x8xf32>
    %9 = arith.mulf %1, %8 : vector<8x4x8xf32>
    %10 = arith.mulf %1, %1 : vector<8x4x8xf32>
    %cst_15 = arith.constant dense<0.000000e+00> : vector<8x4xf32>
    %11 = vector.multi_reduction <add>, %10, %cst_15 [2] : vector<8x4x8xf32> to vector<8x4xf32>
    %12 = vector.shape_cast %11 : vector<8x4xf32> to vector<8x4x1xf32>
    %13 = math.sqrt %12 : vector<8x4x1xf32>
    %cst_16 = arith.constant 9.99999997E-7 : f32
    %14 = vector.broadcast %cst_16 : f32 to vector<8x4x1xf32>
    %15 = arith.addf %13, %14 : vector<8x4x1xf32>
    %16 = vector.broadcast %15 : vector<8x4x1xf32> to vector<8x4x8xf32>
    %17 = arith.divf %1, %16 : vector<8x4x8xf32>
    %18 = arith.mulf %5, %5 : vector<1x4x8xf32>
    %cst_17 = arith.constant dense<0.000000e+00> : vector<1x4xf32>
    %19 = vector.multi_reduction <add>, %18, %cst_17 [2] : vector<1x4x8xf32> to vector<1x4xf32>
    %20 = vector.shape_cast %19 : vector<1x4xf32> to vector<1x4x1xf32>
    %21 = math.sqrt %20 : vector<1x4x1xf32>
    %cst_18 = arith.constant 9.99999997E-7 : f32
    %22 = vector.broadcast %cst_18 : f32 to vector<1x4x1xf32>
    %23 = arith.addf %21, %22 : vector<1x4x1xf32>
    %24 = vector.broadcast %23 : vector<1x4x1xf32> to vector<1x4x8xf32>
    %25 = arith.divf %5, %24 : vector<1x4x8xf32>
    %26 = vector.extract_strided_slice %17 {offsets = [0, 0, 0], sizes = [7, 4, 8], strides = [1, 1, 1]} : vector<8x4x8xf32> to vector<7x4x8xf32>
    %27 = tpu.concatenate %25, %26 in 0 : vector<1x4x8xf32>, vector<7x4x8xf32> -> vector<8x4x8xf32>
    %28 = vector.extract_strided_slice %3 {offsets = [0, 0, 0], sizes = [7, 4, 8], strides = [1, 1, 1]} : vector<8x4x8xf32> to vector<7x4x8xf32>
    %29 = tpu.concatenate %7, %28 in 0 : vector<1x4x8xf32>, vector<7x4x8xf32> -> vector<8x4x8xf32>
    %c0_19 = arith.constant 0 : index
    %c0_20 = arith.constant 0 : index
    %c0_21 = arith.constant 0 : index
    %c0_22 = arith.constant 0 : index
    %30 = vector.load %arg8[%c0_19, %c0_20, %c0_21, %c0_22] : memref<1x1x1x4xi32, #tpu.memory_space<vmem>>, vector<1x1x1x4xi32>
    %31 = vector.shape_cast %30 : vector<1x1x1x4xi32> to vector<1x1x4xi32>
    %c0_23 = arith.constant 0 : index
    %c0_24 = arith.constant 0 : index
    %c0_25 = arith.constant 0 : index
    %c0_26 = arith.constant 0 : index
    %32 = vector.load %arg7[%c0_23, %c0_24, %c0_25, %c0_26] : memref<1x8x1x4xi32, #tpu.memory_space<vmem>>, vector<1x7x1x4xi32>
    %33 = vector.shape_cast %32 : vector<1x7x1x4xi32> to vector<7x1x4xi32>
    %34 = tpu.concatenate %31, %33 in 0 : vector<1x1x4xi32>, vector<7x1x4xi32> -> vector<8x1x4xi32>
    %cst_27 = arith.constant dense<0.000000e+00> : vector<8x4x4xf32>
    %35 = tpu.matmul %9, %17, %cst_27 {dimension_numbers = #tpu.dot_dimension_numbers<[2], [2], [1], [1], [0, 0, 0, 1, 1, 1], [0], [0]>} : vector<8x4x8xf32>, vector<8x4x8xf32>, vector<8x4x4xf32> -> vector<8x4x4xf32>
    %cst_28 = arith.constant dense<0.000000e+00> : vector<8x4x4xf32>
    %36 = tpu.matmul %9, %27, %cst_28 {dimension_numbers = #tpu.dot_dimension_numbers<[2], [2], [1], [1], [0, 0, 0, 1, 1, 1], [0], [0]>} : vector<8x4x8xf32>, vector<8x4x8xf32>, vector<8x4x4xf32> -> vector<8x4x4xf32>
    %37 = tpu.iota {dimensions = array<i32: 1>} : vector<1x4x4xi32>
    %38 = tpu.iota {dimensions = array<i32: 2>} : vector<1x4x4xi32>
    %39 = arith.cmpi eq, %37, %38 : vector<1x4x4xi32>
    %cst_29 = arith.constant -1.000000e+05 : f32
    %40 = vector.shape_cast %39 : vector<1x4x4xi1> to vector<1x4x4xi1>
    %41 = vector.broadcast %40 : vector<1x4x4xi1> to vector<8x4x4xi1>
    %42 = vector.broadcast %cst_29 : f32 to vector<8x4x4xf32>
    %43 = arith.select %41, %42, %35 : vector<8x4x4xi1>, vector<8x4x4xf32>
    %c0_30 = arith.constant 0 : index
    %c0_31 = arith.constant 0 : index
    %c0_32 = arith.constant 0 : index
    %c0_33 = arith.constant 0 : index
    %44 = vector.load %arg6[%c0_30, %c0_31, %c0_32, %c0_33] : memref<1x8x4x1xi32, #tpu.memory_space<vmem>>, vector<1x8x4x1xi32>
    %45 = vector.shape_cast %44 : vector<1x8x4x1xi32> to vector<8x4x1xi32>
    %46 = vector.broadcast %45 : vector<8x4x1xi32> to vector<8x4x4xi32>
    %47 = vector.broadcast %34 : vector<8x1x4xi32> to vector<8x4x4xi32>
    %48 = arith.cmpi eq, %46, %47 : vector<8x4x4xi32>
    %cst_34 = arith.constant -1.000000e+05 : f32
    %49 = vector.broadcast %cst_34 : f32 to vector<8x4x4xf32>
    %50 = arith.select %48, %49, %36 : vector<8x4x4xi1>, vector<8x4x4xf32>
    %cst_35 = arith.constant dense<0xFF800000> : vector<8x4xf32>
    %51 = vector.multi_reduction <maximumf>, %43, %cst_35 [2] : vector<8x4x4xf32> to vector<8x4xf32>
    %52 = vector.shape_cast %51 : vector<8x4xf32> to vector<8x4x1xf32>
    %cst_36 = arith.constant dense<0xFF800000> : vector<8x4xf32>
    %53 = vector.multi_reduction <maximumf>, %50, %cst_36 [2] : vector<8x4x4xf32> to vector<8x4xf32>
    %54 = vector.shape_cast %53 : vector<8x4xf32> to vector<8x4x1xf32>
    %55 = arith.maximumf %52, %54 : vector<8x4x1xf32>
    %56 = vector.broadcast %55 : vector<8x4x1xf32> to vector<8x4x4xf32>
    %57 = arith.subf %43, %56 : vector<8x4x4xf32>
    %58 = math.exp %57 : vector<8x4x4xf32>
    %59 = vector.broadcast %55 : vector<8x4x1xf32> to vector<8x4x4xf32>
    %60 = arith.subf %50, %59 : vector<8x4x4xf32>
    %61 = math.exp %60 : vector<8x4x4xf32>
    %cst_37 = arith.constant dense<0.000000e+00> : vector<8x4xf32>
    %62 = vector.multi_reduction <add>, %58, %cst_37 [2] : vector<8x4x4xf32> to vector<8x4xf32>
    %63 = vector.shape_cast %62 : vector<8x4xf32> to vector<8x4x1xf32>
    %cst_38 = arith.constant dense<0.000000e+00> : vector<8x4xf32>
    %64 = vector.multi_reduction <add>, %61, %cst_38 [2] : vector<8x4x4xf32> to vector<8x4xf32>
    %65 = vector.shape_cast %64 : vector<8x4xf32> to vector<8x4x1xf32>
    %66 = arith.addf %63, %65 : vector<8x4x1xf32>
    %cst_39 = arith.constant 1.000000e+00 : f32
    %67 = vector.broadcast %cst_39 : f32 to vector<8x4x1xf32>
    %68 = arith.divf %67, %66 : vector<8x4x1xf32>
    %69 = vector.broadcast %68 : vector<8x4x1xf32> to vector<8x4x4xf32>
    %70 = arith.mulf %58, %69 : vector<8x4x4xf32>
    %71 = vector.broadcast %68 : vector<8x4x1xf32> to vector<8x4x4xf32>
    %72 = arith.mulf %61, %71 : vector<8x4x4xf32>
    %cst_40 = arith.constant dense<0.000000e+00> : vector<8x4x8xf32>
    %73 = tpu.matmul %70, %3, %cst_40 {dimension_numbers = #tpu.dot_dimension_numbers<[2], [1], [1], [2], [0, 0, 0, 1, 1, 2], [0], [0]>} : vector<8x4x4xf32>, vector<8x4x8xf32>, vector<8x4x8xf32> -> vector<8x4x8xf32>
    %cst_41 = arith.constant dense<0.000000e+00> : vector<8x4x8xf32>
    %74 = tpu.matmul %72, %29, %cst_41 {dimension_numbers = #tpu.dot_dimension_numbers<[2], [1], [1], [2], [0, 0, 0, 1, 1, 2], [0], [0]>} : vector<8x4x4xf32>, vector<8x4x8xf32>, vector<8x4x8xf32> -> vector<8x4x8xf32>
    %75 = arith.addf %73, %74 : vector<8x4x8xf32>
    %c0_42 = arith.constant 0 : index
    %c0_43 = arith.constant 0 : index
    %c0_44 = arith.constant 0 : index
    %c0_45 = arith.constant 0 : index
    %76 = vector.load %arg9[%c0_42, %c0_43, %c0_44, %c0_45] : memref<1x8x4x8xf32, #tpu.memory_space<vmem>>, vector<1x8x4x8xf32>
    %77 = vector.shape_cast %76 : vector<1x8x4x8xf32> to vector<8x4x8xf32>
    %78 = vector.shape_cast %75 : vector<8x4x8xf32> to vector<1x8x4x8xf32>
    tpu.vector_store %arg9[%c0_42, %c0_43, %c0_44, %c0_45], %78 {strides = array<i32>} : memref<1x8x4x8xf32, #tpu.memory_space<vmem>>, vector<1x8x4x8xf32>,
    %79 = math.log %66 : vector<8x4x1xf32>
    %80 = arith.addf %55, %79 : vector<8x4x1xf32>
    %c0_46 = arith.constant 0 : index
    %c0_47 = arith.constant 0 : index
    %c0_48 = arith.constant 0 : index
    %c0_49 = arith.constant 0 : index
    %81 = vector.load %arg10[%c0_46, %c0_47, %c0_48, %c0_49] : memref<1x8x4x1xf32, #tpu.memory_space<vmem>>, vector<1x8x4x1xf32>
    %82 = vector.shape_cast %81 : vector<1x8x4x1xf32> to vector<8x4x1xf32>
    %83 = vector.shape_cast %80 : vector<8x4x1xf32> to vector<1x8x4x1xf32>
    tpu.vector_store %arg10[%c0_46, %c0_47, %c0_48, %c0_49], %83 {strides = array<i32>} : memref<1x8x4x1xf32, #tpu.memory_space<vmem>>, vector<1x8x4x1xf32>,
    return
  }
  func.func @transform_0(%arg0: i32, %arg1: i32) -> (i32, i32, i32, i32) {
    %c0_i32 = arith.constant 0 : i32
    %c0_i32_0 = arith.constant 0 : i32
    %c0_i32_1 = arith.constant 0 : i32
    return %arg0, %arg1, %c0_i32, %c0_i32_0 : i32, i32, i32, i32
  }
  func.func @transform_1(%arg0: i32, %arg1: i32) -> (i32, i32, i32, i32) {
    %c8_i32 = arith.constant 8 : i32
    %0 = arith.muli %arg1, %c8_i32 : i32
    %c8_i32_0 = arith.constant 8 : i32
    %1 = arith.addi %0, %c8_i32_0 : i32
    %c1_i32 = arith.constant 1 : i32
    %2 = arith.subi %1, %c1_i32 : i32
    %c8_i32_1 = arith.constant 8 : i32
    %c0_i32 = arith.constant 0 : i32
    %3 = arith.cmpi eq, %c8_i32_1, %c0_i32 : i32
    %c1_i32_2 = arith.constant 1 : i32
    %4 = arith.select %3, %c1_i32_2, %c8_i32_1 : i32
    %5 = arith.remsi %2, %4 : i32
    %c0_i32_3 = arith.constant 0 : i32
    %6 = arith.cmpi ne, %5, %c0_i32_3 : i32
    %c0_i32_4 = arith.constant 0 : i32
    %7 = arith.cmpi slt, %5, %c0_i32_4 : i32
    %c0_i32_5 = arith.constant 0 : i32
    %8 = arith.cmpi slt, %4, %c0_i32_5 : i32
    %9 = arith.xori %7, %8 : i1
    %10 = arith.andi %9, %6 : i1
    %11 = arith.addi %5, %4 : i32
    %12 = arith.select %10, %11, %5 : i32
    %c0_i32_6 = arith.constant 0 : i32
    %c0_i32_7 = arith.constant 0 : i32
    %c0_i32_8 = arith.constant 0 : i32
    return %arg0, %12, %c0_i32_6, %c0_i32_7 : i32, i32, i32, i32
  }
  func.func @transform_2(%arg0: i32, %arg1: i32) -> (i32, i32, i32, i32) {
    %c0_i32 = arith.constant 0 : i32
    %c0_i32_0 = arith.constant 0 : i32
    %c0_i32_1 = arith.constant 0 : i32
    return %arg0, %arg1, %c0_i32, %c0_i32_0 : i32, i32, i32, i32
  }
  func.func @transform_3(%arg0: i32, %arg1: i32) -> (i32, i32, i32, i32) {
    %c8_i32 = arith.constant 8 : i32
    %0 = arith.muli %arg1, %c8_i32 : i32
    %c8_i32_0 = arith.constant 8 : i32
    %1 = arith.addi %0, %c8_i32_0 : i32
    %c1_i32 = arith.constant 1 : i32
    %2 = arith.subi %1, %c1_i32 : i32
    %c8_i32_1 = arith.constant 8 : i32
    %c0_i32 = arith.constant 0 : i32
    %3 = arith.cmpi eq, %c8_i32_1, %c0_i32 : i32
    %c1_i32_2 = arith.constant 1 : i32
    %4 = arith.select %3, %c1_i32_2, %c8_i32_1 : i32
    %5 = arith.remsi %2, %4 : i32
    %c0_i32_3 = arith.constant 0 : i32
    %6 = arith.cmpi ne, %5, %c0_i32_3 : i32
    %c0_i32_4 = arith.constant 0 : i32
    %7 = arith.cmpi slt, %5, %c0_i32_4 : i32
    %c0_i32_5 = arith.constant 0 : i32
    %8 = arith.cmpi slt, %4, %c0_i32_5 : i32
    %9 = arith.xori %7, %8 : i1
    %10 = arith.andi %9, %6 : i1
    %11 = arith.addi %5, %4 : i32
    %12 = arith.select %10, %11, %5 : i32
    %c0_i32_6 = arith.constant 0 : i32
    %c0_i32_7 = arith.constant 0 : i32
    %c0_i32_8 = arith.constant 0 : i32
    return %arg0, %12, %c0_i32_6, %c0_i32_7 : i32, i32, i32, i32
  }
  func.func @transform_4(%arg0: i32, %arg1: i32) -> (i32, i32, i32, i32) {
    %c0_i32 = arith.constant 0 : i32
    %c0_i32_0 = arith.constant 0 : i32
    %c0_i32_1 = arith.constant 0 : i32
    return %arg0, %arg1, %c0_i32, %c0_i32_0 : i32, i32, i32, i32
  }
  func.func @transform_5(%arg0: i32, %arg1: i32) -> (i32, i32, i32, i32) {
    %c0_i32 = arith.constant 0 : i32
    %c0_i32_0 = arith.constant 0 : i32
    %c0_i32_1 = arith.constant 0 : i32
    return %arg0, %arg1, %c0_i32, %c0_i32_0 : i32, i32, i32, i32
  }
  func.func @transform_6(%arg0: i32, %arg1: i32) -> (i32, i32, i32, i32) {
    %c8_i32 = arith.constant 8 : i32
    %0 = arith.muli %arg1, %c8_i32 : i32
    %c8_i32_0 = arith.constant 8 : i32
    %1 = arith.addi %0, %c8_i32_0 : i32
    %c1_i32 = arith.constant 1 : i32
    %2 = arith.subi %1, %c1_i32 : i32
    %c8_i32_1 = arith.constant 8 : i32
    %c0_i32 = arith.constant 0 : i32
    %3 = arith.cmpi eq, %c8_i32_1, %c0_i32 : i32
    %c1_i32_2 = arith.constant 1 : i32
    %4 = arith.select %3, %c1_i32_2, %c8_i32_1 : i32
    %5 = arith.remsi %2, %4 : i32
    %c0_i32_3 = arith.constant 0 : i32
    %6 = arith.cmpi ne, %5, %c0_i32_3 : i32
    %c0_i32_4 = arith.constant 0 : i32
    %7 = arith.cmpi slt, %5, %c0_i32_4 : i32
    %c0_i32_5 = arith.constant 0 : i32
    %8 = arith.cmpi slt, %4, %c0_i32_5 : i32
    %9 = arith.xori %7, %8 : i1
    %10 = arith.andi %9, %6 : i1
    %11 = arith.addi %5, %4 : i32
    %12 = arith.select %10, %11, %5 : i32
    %c0_i32_6 = arith.constant 0 : i32
    %c0_i32_7 = arith.constant 0 : i32
    %c0_i32_8 = arith.constant 0 : i32
    return %arg0, %12, %c0_i32_6, %c0_i32_7 : i32, i32, i32, i32
  }
  func.func @transform_7(%arg0: i32, %arg1: i32) -> (i32, i32, i32, i32) {
    %c0_i32 = arith.constant 0 : i32
    %c0_i32_0 = arith.constant 0 : i32
    %c0_i32_1 = arith.constant 0 : i32
    return %arg0, %arg1, %c0_i32, %c0_i32_0 : i32, i32, i32, i32
  }
  func.func @transform_8(%arg0: i32, %arg1: i32) -> (i32, i32, i32, i32) {
    %c0_i32 = arith.constant 0 : i32
    %c0_i32_0 = arith.constant 0 : i32
    %c0_i32_1 = arith.constant 0 : i32
    return %arg0, %arg1, %c0_i32, %c0_i32_0 : i32, i32, i32, i32
  }
}

module attributes {stable_mosaic.version = 11 : i64} {
  func.func @_linear_bias_kernel(%arg0: i32, %arg1: i32, %arg2: memref<32x32xf32, #tpu.memory_space<vmem>>, %arg3: memref<32x32xf32, #tpu.memory_space<vmem>>, %arg4: memref<1x32xf32, #tpu.memory_space<vmem>>, %arg5: memref<32x32xf32, #tpu.memory_space<vmem>>) attributes {dimension_semantics = [#tpu.dimension_semantics<parallel>, #tpu.dimension_semantics<parallel>], iteration_bounds = array<i64: 1, 1>, scalar_prefetch = 0 : i64, scratch_operands = 0 : i64, tpu.core_type = #tpu.core_type<tc>, window_params = [{transform_indices = @transform_0, window_bounds = array<i64: 32, 32>}, {transform_indices = @transform_1, window_bounds = array<i64: 32, 32>}, {transform_indices = @transform_2, window_bounds = array<i64: 1, 32>}, {transform_indices = @transform_3, window_bounds = array<i64: 32, 32>}]} {
    %c0 = arith.constant 0 : index
    %c0_0 = arith.constant 0 : index
    %0 = vector.load %arg2[%c0, %c0_0] : memref<32x32xf32, #tpu.memory_space<vmem>>, vector<32x32xf32>
    %c0_1 = arith.constant 0 : index
    %c0_2 = arith.constant 0 : index
    %1 = vector.load %arg3[%c0_1, %c0_2] : memref<32x32xf32, #tpu.memory_space<vmem>>, vector<32x32xf32>
    %cst = arith.constant dense<0.000000e+00> : vector<32x32xf32>
    %2 = tpu.matmul %0, %1, %cst {dimension_numbers = #tpu.dot_dimension_numbers<[1], [0], [0], [1], [0, 0, 1, 1], [], []>} : vector<32x32xf32>, vector<32x32xf32>, vector<32x32xf32> -> vector<32x32xf32>
    %c0_3 = arith.constant 0 : index
    %c0_4 = arith.constant 0 : index
    %3 = vector.load %arg4[%c0_3, %c0_4] : memref<1x32xf32, #tpu.memory_space<vmem>>, vector<1x32xf32>
    %4 = vector.broadcast %3 : vector<1x32xf32> to vector<32x32xf32>
    %5 = arith.addf %2, %4 : vector<32x32xf32>
    %c0_5 = arith.constant 0 : index
    %c0_6 = arith.constant 0 : index
    %6 = vector.load %arg5[%c0_5, %c0_6] : memref<32x32xf32, #tpu.memory_space<vmem>>, vector<32x32xf32>
    tpu.vector_store %arg5[%c0_5, %c0_6], %5 {strides = array<i32>} : memref<32x32xf32, #tpu.memory_space<vmem>>, vector<32x32xf32>,
    return
  }
  func.func @transform_0(%arg0: i32, %arg1: i32) -> (i32, i32) {
    %c0_i32 = arith.constant 0 : i32
    %c0_i32_0 = arith.constant 0 : i32
    return %arg0, %c0_i32 : i32, i32
  }
  func.func @transform_1(%arg0: i32, %arg1: i32) -> (i32, i32) {
    %c0_i32 = arith.constant 0 : i32
    %c0_i32_0 = arith.constant 0 : i32
    return %c0_i32, %arg1 : i32, i32
  }
  func.func @transform_2(%arg0: i32, %arg1: i32) -> (i32, i32) {
    %c0_i32 = arith.constant 0 : i32
    %c0_i32_0 = arith.constant 0 : i32
    return %c0_i32, %arg1 : i32, i32
  }
  func.func @transform_3(%arg0: i32, %arg1: i32) -> (i32, i32) {
    %c0_i32 = arith.constant 0 : i32
    return %arg0, %arg1 : i32, i32
  }
}

</mosaic_0001>

<bundles_post_ra>
// kernel: lsh_self_attention.4
= control target key start
LH: loop header
LB: loop body
LE: loop exit
PB: predicated region body
PF: predicated region fallthrough
CT: control target
= control target key end

     0   :  { %vm19_vm0 = vcmask 261120   ;;  %s218_s1 = inlined_call_operand.vmem [shape: f32[32,32], index: 1, kind: input, shape index: {}]   ;;  %s219_s0 = inlined_call_operand.vmem [shape: f32[32,32], index: 0, kind: input, shape index: {}]   ;;  %s220_s2 = inlined_call_operand.vmem [shape: f32[32,32], index: 2, kind: output, shape index: {}]  }
   0x1   :  { %v18_v0 = vld [vmem:[%s218_s1 + $0x18] sm:$0xff]  ;;  %v17_v1 = vld [vmem:[%s218_s1 + $0x10] sm:$0xff]  ;;  %v16_v2 = vld [vmem:[%s218_s1 + $0x8] sm:$0xff] }
   0x2   :  { %137 = vmatprep.subr.mxu0 %v18_v0  ;;  %151 = vmatprep.subr.mxu1 %v18_v0  ;;  %v15_v3 = vld [vmem:[%s218_s1] sm:$0xff]  ;;  %v13_v5 = vld [vmem:[%s219_s0 + $0x10] sm:$0xff]  ;;  %v12_v6 = vld [vmem:[%s219_s0 + $0x8] sm:$0xff] }
   0x3   :  { %138 = vmatpush3.msra.mxu0 %v18_v0  ;;  %155 = vmatpush3.msra.mxu1 %v18_v0  ;;  %v11_v4 = vld [vmem:[%s219_s0] sm:$0xff]  ;;  %v14_v7 = vld [vmem:[%s219_s0 + $0x18] sm:$0xff] }
   0x4   :  { %139 = vmatprep.subr.mxu0 %v17_v1  ;;  %152 = vmatprep.subr.mxu1 %v17_v1 }
   0x5   :  { %140 = vmatpush3.msra.mxu0 %v17_v1  ;;  %156 = vmatpush3.msra.mxu1 %v17_v1 }
   0x6   :  { %141 = vmatprep.subr.mxu0 %v16_v2  ;;  %153 = vmatprep.subr.mxu1 %v16_v2 }
   0x7   :  { %142 = vmatpush3.msra.mxu0 %v16_v2  ;;  %157 = vmatpush3.msra.mxu1 %v16_v2 }
   0x8   :  { %143 = vmatprep.subr.mxu0 %v15_v3  ;;  %154 = vmatprep.subr.mxu1 %v15_v3 }
   0x9   :  { %144 = vmatpush3.msra.mxu0 %v15_v3  ;;  %158 = vmatpush3.msra.mxu1 %v15_v3 }
   0xa   :  { %145 = vmatprep.mubr.msk.f32.mxu0 %vm19_vm0, %v11_v4  ;;  %148 = vmatprep.mubr.msk.f32.mxu1 %vm19_vm0, %v13_v5 }
   0xb   :  { %146 = vmatmul.mubr.msk.f32.vlgmr.msra.gmra.mxu0 %vm19_vm0, %v12_v6  ;;  %149 = vmatmul.mubr.msk.f32.vlgmr.msra.gmra.mxu1 %vm19_vm0, %v14_v7 }
  0xcb   :  { %v147_v8 = vpop.f32.mrf.mxu0  ;;  %v150_v9 = vpop.f32.mrf.mxu1 }
  0xcc   :  { %118 = vst.msk [vmem:[%s220_s2 + $0x8] sm:$0xff] %vm19_vm0, %v147_v8  ;;  %120 = vst.msk [vmem:[%s220_s2 + $0x18] sm:$0xff] %vm19_vm0, %v150_v9 }
  0xcd   :  { %v98_v10 = vpop.f32.mrf.mxu0  ;;  %v108_v11 = vpop.f32.mrf.mxu1 }
  0xce   :  { %117 = vst.msk [vmem:[%s220_s2] sm:$0xff] %vm19_vm0, %v98_v10  ;;  %119 = vst.msk [vmem:[%s220_s2 + $0x10] sm:$0xff] %vm19_vm0, %v108_v11 }

// kernel: lsh_self_attention.6
= control target key start
LH: loop header
LB: loop body
LE: loop exit
PB: predicated region body
PF: predicated region fallthrough
CT: control target
= control target key end

     0   :  { %s4487_s27 = smov 0   ;;  %s4489_s28 = smov 0   ;;  %s5124_s0 = inlined_call_operand.vmem [shape: f32[8,8,4,8], index: 0, kind: input, shape index: {}, may-alias: {0,1}]   ;;  %s5125_s1 = inlined_call_operand.vmem [shape: f32[8,8,4,8], index: 1, kind: input, shape index: {}, may-alias: {0,1}]   ;;  %s5126_s2 = inlined_call_operand.vmem [shape: f32[8,8,4,8], index: 2, kind: input, shape index: {}, may-alias: {2,3}]   ;;  %s5127_s3 = inlined_call_operand.vmem [shape: f32[8,8,4,8], index: 3, kind: input, shape index: {}, may-alias: {2,3}]   ;;  %s5128_s4 = inlined_call_operand.vmem [shape: s32[8,8,4,1], index: 4, kind: input, shape index: {}]   ;;  %s5129_s5 = inlined_call_operand.vmem [shape: s32[8,8,1,4], index: 5, kind: input, shape index: {}, may-alias: {5,6}]   ;;  %s5130_s6 = inlined_call_operand.vmem [shape: s32[8,8,1,4], index: 6, kind: input, shape index: {}, may-alias: {5,6}]   ;;  %s5131_s7 = inlined_call_operand.vmem [shape: f32[8,8,4,8], index: 7, kind: output, shape index: {0}]   ;;  %s5132_s8 = inlined_call_operand.vmem [shape: f32[8,8,4,1], index: 8, kind: output, shape index: {1}]  }
   0x1   :  { %s4491_s29 = smov 0  }
   0x2 LB: > { %s31_s30 = sadd.s32 1, %s4433_s28  ;;  %p3960_p0 = scmp.ge.s32.totalorder %s4437_s29, 1  ;;  %s4437_s29 = sphi %s4491_s29, %s19_s29   ;;  %s4433_s28 = sphi %s4489_s28, %s5136_s28   ;;  %s4429_s27 = sphi %s4487_s27, %s5135_s27  }
   0x3   : > { %p33_p1 = scmp.ge.s32.totalorder %s31_s30, 8  ;;  %p550_p2 = scmp.lt.s32.totalorder %s4437_s29, 9 }
   0x5   : > { %s5138_s30 = smov (%p33_p1, %s31_s30), 0  ;;  %p551_p3 = pnand %p3960_p0, %p550_p2 }
   0x6   : > { %p693_p4 = scmp.lt.s32.totalorder (!%p551_p3), %s4429_s27, 7 }
   0x7   : > { %554 = sbr.rel (%p551_p3) target bundleno = 967 (0x3c7), region = 48 }
   0xc   : > { %s5140_s27 = smov (!%p693_p4, %s4429_s27), 7  ;;  %vm892_vm0 = vcmask 60416   ;;  %v4439_v27 = vmov 0.0   ;;  %vm4440_vm1 = vmmov 0   ;;  %v4441_v28 = vmov 0  }
   0xd   : > { %s4508_s9 = sshll.u32 %s5140_s27, 5  ;;  %4126 = vmatprep.subr.mxu0 %v4439_v27  ;;  %4131 = vmatprep.subr.mxu1 %v4439_v27  ;;  %s3971_s20 = sshll.u32 %s5140_s27, 3 }
   0xe   : > { %s700_s12 = scalar_lea.vmem %s5124_s0, %s4508_s9  ;;  %s4053_s13 = sadd.s32 28, %s4508_s9  ;;  %4128 = vmatprep.mubr.msk.f32.mxu0 %vm4440_vm1, %v4439_v27  ;;  %4133 = vmatprep.mubr.msk.f32.mxu1 %vm4440_vm1, %v4439_v27 }
   0xf   : > { %v4514_v0 = vld [vmem:[%s700_s12 + $0x8] sm:$0xf]  ;;  %v4516_v1 = vld [vmem:[%s700_s12] sm:$0xf]  ;;  %v4518_v2 = vld [vmem:[%s700_s12 + $0xc] sm:$0xf]  ;;  %s723_s16 = scalar_lea.vmem %s5125_s1, %s4053_s13  ;;  %s792_s19 = scalar_lea.vmem %s5128_s4, %s4508_s9  ;;  %4313 = vset.pattern.permute.xlu1 %v4441_v28  ;;  %4314 = vset.pattern.permute.xlu0 %v4441_v28 }
  0x10   : > { %v886_v3 = vmul.f32 %v4514_v0, %v4514_v0  ;;  %v884_v4 = vmul.f32 %v4516_v1, %v4516_v1  ;;  %v4524_v5 = vld [vmem:[%s700_s12 + $0x4] sm:$0xf]  ;;  %v887_v6 = vmul.f32 %v4518_v2, %v4518_v2  ;;  %v4530_v8 = vld [vmem:[%s700_s12 + $0x14] sm:$0xf]  ;;  %v4534_v11 = vld [vmem:[%s700_s12 + $0x10] sm:$0xf]  ;;  %s4745_s10 = scalar_lea.vmem %s5129_s5, %s3971_s20  ;;  %s4948_s18 = scalar_lea.vmem %s5132_s8, %s4508_s9 }
  0x11   : > { %v885_v7 = vmul.f32 %v4524_v5, %v4524_v5  ;;  %v889_v14 = vmul.f32 %v4530_v8, %v4530_v8  ;;  %v888_v15 = vmul.f32 %v4534_v11, %v4534_v11  ;;  %v4543_v16 = vld [vmem:[%s700_s12 + $0x1c] sm:$0xf]  ;;  %v4545_v17 = vld [vmem:[%s700_s12 + $0x18] sm:$0xf]  ;;  %v4558_v22 = vld [vmem:[%s723_s16] sm:$0xf]  ;;  %s769_s12 = scalar_lea.vmem %s5127_s3, %s4053_s13  ;;  %s4929_s16 = scalar_lea.vmem %s5126_s2, %s4508_s9 }
  0x12   : > { %v899_v9 = vsel %vm892_vm0, %v886_v3, 0.0  ;;  %v893_v10 = vsel %vm892_vm0, %v884_v4, 0.0  ;;  %v902_v12 = vsel %vm892_vm0, %v887_v6, 0.0  ;;  %v891_v20 = vmul.f32 %v4543_v16, %v4543_v16  ;;  %v2206_v29 = vld [vmem:[%s792_s19] sm:$0xf]  ;;  %s822_s21 = sadd.s32 7, %s3971_s20 }
  0x13   : > { %900 = vadd.xlane.f32.xlu1 %v899_v9  ;;  %894 = vadd.xlane.f32.xlu0 %v893_v10  ;;  %v896_v13 = vsel %vm892_vm0, %v885_v7, 0.0  ;;  %v908_v18 = vsel %vm892_vm0, %v889_v14, 0.0  ;;  %v905_v19 = vsel %vm892_vm0, %v888_v15, 0.0  ;;  %v890_v21 = vmul.f32 %v4545_v17, %v4545_v17  ;;  %v2208_v30 = vld [vmem:[%s792_s19 + $0x8] sm:$0xf]  ;;  %s823_s24 = scalar_lea.vmem %s5130_s6, %s822_s21  ;;  %s5097_s21 = scalar_lea.vmem %s5131_s7, %s4508_s9 }
  0x14   : > { %v914_v23 = vsel %vm892_vm0, %v891_v20, 0.0  ;;  %v997_v25 = vmul.f32 %v4558_v22, %v4558_v22  ;;  %v2207_v31 = vld [vmem:[%s792_s19 + $0x4] sm:$0xf]  ;;  %v2209_v32 = vld [vmem:[%s792_s19 + $0xc] sm:$0xf] }
  0x15   : > { %v911_v24 = vsel %vm892_vm0, %v890_v21, 0.0  ;;  %v2210_v33 = vld [vmem:[%s792_s19 + $0x10] sm:$0xf]  ;;  %v2211_v34 = vld [vmem:[%s792_s19 + $0x14] sm:$0xf] }
  0x16   : > { %v998_v26 = vsel %vm892_vm0, %v997_v25, 0.0  ;;  %v2212_v35 = vld [vmem:[%s792_s19 + $0x18] sm:$0xf]  ;;  %v2213_v36 = vld [vmem:[%s792_s19 + $0x1c] sm:$0xf] }
  0x17   : > { %903 = vadd.xlane.f32.xlu1 %v902_v12  ;;  %897 = vadd.xlane.f32.xlu0 %v896_v13 }
  0x1b   : > { %909 = vadd.xlane.f32.xlu1 %v908_v18  ;;  %906 = vadd.xlane.f32.xlu0 %v905_v19 }
  0x1f   : > { %915 = vadd.xlane.f32.xlu1 %v914_v23  ;;  %912 = vadd.xlane.f32.xlu0 %v911_v24 }
  0x23   : > { %999 = vadd.xlane.f32.xlu0 %v998_v26 }
  0x30   : > { %2215 = vperm.xlu1 %4313, %v2206_v29  }
  0x34   : > { %2221 = vperm.xlu1 %4313, %v2208_v30  }
  0x38   : > { %2224 = vperm.xlu1 %4313, %v2209_v32  }
  0x39   : > { %2218 = vperm.xlu0 %4314, %v2207_v31  }
  0x3c   : > { %2227 = vperm.xlu1 %4313, %v2210_v33  }
  0x40   : > { %2230 = vperm.xlu1 %4313, %v2211_v34  }
  0x44   : > { %2233 = vperm.xlu1 %4313, %v2212_v35  }
  0x48   : > { %2236 = vperm.xlu1 %4313, %v2213_v36  }
  0x9c   : > { %v901_v37 = vpop.xlane.xlu1 %900  ;;  %v895_v38 = vpop.xlane.xlu0 %894 }
  0x9d   : > { %4315 = vrsqrt.f32 %v901_v37  ;;  %vm933_vm2 = vcmp.eq.f32.partialorder %v901_v37, inf  ;;  %vm935_vm3 = vcmp.eq.f32.partialorder %v901_v37, 0.0  ;;  %v936_v48 = vand.u32 2147483648, %v901_v37 }
  0x9e   : > { %4317 = vrsqrt.f32 %v895_v38  ;;  %vm919_vm4 = vcmp.eq.f32.partialorder %v895_v38, inf  ;;  %v922_v52 = vand.u32 2147483648, %v895_v38  ;;  %vm921_vm5 = vcmp.eq.f32.partialorder %v895_v38, 0.0 }
  0xa0   : > { %v904_v39 = vpop.xlane.xlu1 %903  ;;  %v898_v40 = vpop.xlane.xlu0 %897 }
  0xa1   : > { %4319 = vrsqrt.f32 %v904_v39  ;;  %vm940_vm6 = vcmp.eq.f32.partialorder %v904_v39, inf  ;;  %v943_v61 = vand.u32 2147483648, %v904_v39  ;;  %vm942_vm7 = vcmp.eq.f32.partialorder %v904_v39, 0.0 }
  0xa2   : > { %4321 = vrsqrt.f32 %v898_v40  ;;  %vm926_vm8 = vcmp.eq.f32.partialorder %v898_v40, inf  ;;  %v929_v3 = vand.u32 2147483648, %v898_v40  ;;  %vm928_vm9 = vcmp.eq.f32.partialorder %v898_v40, 0.0 }
  0xa4   : > { %v910_v41 = vpop.xlane.xlu1 %909  ;;  %v907_v42 = vpop.xlane.xlu0 %906 }
  0xa5   : > { %4323 = vrsqrt.f32 %v910_v41  ;;  %vm954_vm10 = vcmp.eq.f32.partialorder %v910_v41, inf  ;;  %v957_v13 = vand.u32 2147483648, %v910_v41  ;;  %vm956_vm11 = vcmp.eq.f32.partialorder %v910_v41, 0.0 }
  0xa6   : > { %4325 = vrsqrt.f32 %v907_v42  ;;  %vm947_vm12 = vcmp.eq.f32.partialorder %v907_v42, inf  ;;  %v950_v20 = vand.u32 2147483648, %v907_v42  ;;  %vm949_vm13 = vcmp.eq.f32.partialorder %v907_v42, 0.0 }
  0xa8   : > { %v4575_v43 = vpop.xlane.xlu1 %915  ;;  %v4577_v44 = vpop.xlane.xlu0 %912 }
  0xa9   : > { %4327 = vrsqrt.f32 %v4575_v43  ;;  %vm968_vm14 = vcmp.eq.f32.partialorder %v4575_v43, inf  ;;  %v971_v29 = vand.u32 2147483648, %v4575_v43  ;;  %vm970_vm15 = vcmp.eq.f32.partialorder %v4575_v43, 0.0 }
  0xaa   : > { %v4316_v45 = vpop.eup %4315  ;;  %4329 = vrsqrt.f32 %v4577_v44  ;;  %v964_v34 = vand.u32 2147483648, %v4577_v44 }
  0xab   : > { %v4318_v46 = vpop.eup %4317  ;;  %v932_v47 = vmul.f32 %v4316_v45, %v901_v37 }
  0xac   : > { %v918_v49 = vmul.f32 %v4318_v46, %v895_v38  ;;  %v4581_v50 = vpop.xlane.xlu0 %999 }
  0xad   : > { %v934_v51 = vsel %vm933_vm2, %v901_v37, %v932_v47  ;;  %4331 = vrsqrt.f32 %v4581_v50  ;;  %vm961_vm2 = vcmp.eq.f32.partialorder %v4577_v44, inf }
  0xae   : > { %v4320_v53 = vpop.eup %4319  ;;  %v937_v54 = vsel %vm935_vm3, %v936_v48, %v934_v51  ;;  %v920_v55 = vsel %vm919_vm4, %v895_v38, %v918_v49  ;;  %vm963_vm3 = vcmp.eq.f32.partialorder %v4577_v44, 0.0  ;;  %vm1003_vm4 = vcmp.eq.f32.partialorder %v4581_v50, inf }
  0xaf   : > { %v4322_v56 = vpop.eup %4321  ;;  %v923_v57 = vsel %vm921_vm5, %v922_v52, %v920_v55  ;;  %v939_v58 = vmul.f32 %v4320_v53, %v904_v39  ;;  %v975_v59 = vadd.f32 1e-06, %v937_v54  ;;  %vm1005_vm5 = vcmp.eq.f32.partialorder %v4581_v50, 0.0 }
  0xb0   : > { %v973_v60 = vadd.f32 1e-06, %v923_v57  ;;  %v925_v62 = vmul.f32 %v4322_v56, %v898_v40  ;;  %v876_v49 = vmul.f32 0.35355338, %v4516_v1  ;;  %v878_v54 = vmul.f32 0.35355338, %v4514_v0 }
  0xb1   : > { %v941_v63 = vsel %vm940_vm6, %v904_v39, %v939_v58  ;;  %vm1019_vm6 = vcmask 64512   ;;  %v877_v55 = vmul.f32 0.35355338, %v4524_v5  ;;  %v880_v58 = vmul.f32 0.35355338, %v4534_v11 }
  0xb2   : > { %v4324_v4 = vpop.eup %4323  ;;  %4333 = vrcp.f32 %v973_v60  ;;  %v944_v6 = vsel %vm942_vm7, %v943_v61, %v941_v63  ;;  %v927_v7 = vsel %vm926_vm8, %v898_v40, %v925_v62  ;;  %v881_v61 = vmul.f32 0.35355338, %v4530_v8 }
  0xb3   : > { %v4326_v9 = vpop.eup %4325  ;;  %v930_v10 = vsel %vm928_vm9, %v929_v3, %v927_v7  ;;  %v953_v12 = vmul.f32 %v4324_v4, %v910_v41  ;;  %4335 = vrcp.f32 %v975_v59  ;;  %v976_v14 = vadd.f32 1e-06, %v944_v6 }
  0xb4   : > { %v974_v15 = vadd.f32 1e-06, %v930_v10  ;;  %v946_v18 = vmul.f32 %v4326_v9, %v907_v42  ;;  %v882_v62 = vmul.f32 0.35355338, %v4545_v17  ;;  %vm2286_vm8 = vcmask 27648  }
  0xb5   : > { %v955_v19 = vsel %vm954_vm10, %v910_v41, %v953_v12 }
  0xb6   : > { %v4328_v21 = vpop.eup %4327  ;;  %4337 = vrcp.f32 %v974_v15  ;;  %v958_v23 = vsel %vm956_vm11, %v957_v13, %v955_v19  ;;  %v948_v24 = vsel %vm947_vm12, %v907_v42, %v946_v18  ;;  %v1006_v42 = vand.u32 2147483648, %v4581_v50 }
  0xb7   : > { %v4330_v25 = vpop.eup %4329  ;;  %v951_v26 = vsel %vm949_vm13, %v950_v20, %v948_v24  ;;  %v967_v28 = vmul.f32 %v4328_v21, %v4575_v43  ;;  %4339 = vrcp.f32 %v976_v14  ;;  %v978_v30 = vadd.f32 1e-06, %v958_v23 }
  0xb8   : > { %v977_v31 = vadd.f32 1e-06, %v951_v26  ;;  %v960_v32 = vmul.f32 %v4330_v25, %v4577_v44 }
  0xb9   : > { %v969_v33 = vsel %vm968_vm14, %v4575_v43, %v967_v28 }
  0xba   : > { %v4332_v35 = vpop.eup %4331  ;;  %4341 = vrcp.f32 %v977_v31  ;;  %v972_v36 = vsel %vm970_vm15, %v971_v29, %v969_v33  ;;  %v962_v37 = vsel %vm961_vm2, %v4577_v44, %v960_v32 }
  0xbb   : > { %v965_v38 = vsel %vm963_vm3, %v964_v34, %v962_v37  ;;  %v1002_v39 = vmul.f32 %v4332_v35, %v4581_v50  ;;  %4343 = vrcp.f32 %v978_v30  ;;  %v980_v40 = vadd.f32 1e-06, %v972_v36  ;;  %v4009_v36 = vld [vmem:[%s823_s24] ss:$0 sm:$0xff] }
  0xbc   : > { %v979_v41 = vadd.f32 1e-06, %v965_v38  ;;  %vm2483_vm3 = vcmask 1043456  }
  0xbd   : > { %v1004_v43 = vsel %vm1003_vm4, %v4581_v50, %v1002_v39  ;;  %vm2479_vm4 = vcmask 31744  }
  0xbe   : > { %4345 = vrcp.f32 %v979_v41  ;;  %v1007_v45 = vsel %vm1005_vm5, %v1006_v42, %v1004_v43  ;;  %vm3708_vm5 = vcmask 3072  }
  0xbf   : > { %v4334_v46 = vpop.eup %4333  ;;  %v1008_v47 = vadd.f32 1e-06, %v1007_v45  ;;  %4347 = vrcp.f32 %v980_v40 }
  0xc0   : > { %v982_v44 = vmul.f32 %v4334_v46, %v4516_v1  ;;  %v4336_v48 = vpop.eup %4335 }
  0xc1   : > { %4349 = vrcp.f32 %v1008_v47  ;;  %v986_v50 = vmul.f32 %v4336_v48, %v4514_v0  ;;  %v4011_v47 = vld [vmem:[%s4745_s10 + $0x1] ss:$0 sm:$0xff]  ;;  %v2219_v48 = vpop.permute.xlu0 %2218 }
  0xc2   : > { %4127 = vmatpush3.xpose.msk.msra.mxu0 %vm1019_vm6, %v982_v44 }
  0xc3   : > { %v4338_v51 = vpop.eup %4337  ;;  %4136 = vmatprep.subr.mxu0 %v4439_v27 }
  0xc4   : > { %v984_v52 = vmul.f32 %v4338_v51, %v4524_v5  ;;  %v4340_v53 = vpop.eup %4339  ;;  %v879_v5 = vmul.f32 0.35355338, %v4518_v2 }
  0xc5   : > { %4129 = vmatmul.mubr.msk.f32.vlgmr.msra.gmra.mxu0 %vm1019_vm6, %v876_v49  ;;  %v988_v56 = vmul.f32 %v4340_v53, %v4518_v2 }
  0xc6   : > { %4132 = vmatpush3.xpose.msk.msra.mxu1 %vm1019_vm6, %v984_v52  ;;  %4137 = vmatpush3.xpose.msk.msra.mxu0 %vm1019_vm6, %v986_v50 }
  0xc7   : > { %v4342_v1 = vpop.eup %4341  ;;  %4138 = vmatprep.mubr.msk.f32.mxu0 %vm4440_vm1, %v4439_v27  ;;  %4141 = vmatprep.subr.mxu1 %v4439_v27 }
  0xc8   : > { %4146 = vmatprep.subr.mxu0 %v4439_v27  ;;  %v990_v0 = vmul.f32 %v4342_v1, %v4534_v11  ;;  %v4344_v57 = vpop.eup %4343 }
  0xc9   : > { %4134 = vmatmul.mubr.msk.f32.vlgmr.msra.gmra.mxu1 %vm1019_vm6, %v877_v55  ;;  %4139 = vmatmul.mubr.msk.f32.vlgmr.msra.gmra.mxu0 %vm1019_vm6, %v878_v54  ;;  %v992_v2 = vmul.f32 %v4344_v57, %v4530_v8 }
  0xca   : > { %4142 = vmatpush3.xpose.msk.msra.mxu1 %vm1019_vm6, %v988_v56  ;;  %4147 = vmatpush3.xpose.msk.msra.mxu0 %vm1019_vm6, %v990_v0 }
  0xcb   : > { %v4346_v59 = vpop.eup %4345  ;;  %4143 = vmatprep.mubr.msk.f32.mxu1 %vm4440_vm1, %v4439_v27  ;;  %4148 = vmatprep.mubr.msk.f32.mxu0 %vm4440_vm1, %v4439_v27 }
  0xcc   : > { %4151 = vmatprep.subr.mxu1 %v4439_v27  ;;  %4156 = vmatprep.subr.mxu0 %v4439_v27  ;;  %v994_v11 = vmul.f32 %v4346_v59, %v4545_v17  ;;  %v4348_v60 = vpop.eup %4347  ;;  %v883_v17 = vmul.f32 0.35355338, %v4543_v16 }
  0xcd   : > { %4144 = vmatmul.mubr.msk.f32.vlgmr.msra.gmra.mxu1 %vm1019_vm6, %v879_v5  ;;  %4149 = vmatmul.mubr.msk.f32.vlgmr.msra.gmra.mxu0 %vm1019_vm6, %v880_v58  ;;  %v996_v8 = vmul.f32 %v4348_v60, %v4543_v16  ;;  %v2191_v16 = vlaneseq }
  0xce   : > { %v4350_v63 = vpop.eup %4349  ;;  %4152 = vmatpush3.xpose.msk.msra.mxu1 %vm1019_vm6, %v992_v2  ;;  %4157 = vmatpush3.xpose.msk.msra.mxu0 %vm1019_vm6, %v994_v11 }
  0xcf   : > { %4153 = vmatprep.mubr.msk.f32.mxu1 %vm4440_vm1, %v4439_v27  ;;  %4158 = vmatprep.mubr.msk.f32.mxu0 %vm4440_vm1, %v4439_v27  ;;  %v1010_v3 = vmul.f32 %v4350_v63, %v4558_v22  ;;  %v2216_v22 = vpop.permute.xlu1 %2215  ;;  %v2192_v4 = vshrl.u32 %v2191_v16, 7  ;;  %v2194_v6 = vand.u32 127, %v2191_v16  ;;  %v4015_v16 = vld [vmem:[%s4745_s10 + $0x5] ss:$0 sm:$0xff] }
  0xd0   : > { %4161 = vmatprep.subr.mxu1 %v4439_v27  ;;  %4166 = vmatprep.subr.mxu0 %v4439_v27  ;;  %vm2270_vm9 = vcmp.eq.s32.totalorder %v2216_v22, %v4009_v36 }
  0xd1   : > { %4154 = vmatmul.mubr.msk.f32.vlgmr.msra.gmra.mxu1 %vm1019_vm6, %v881_v61  ;;  %4159 = vmatmul.mubr.msk.f32.vlgmr.msra.gmra.mxu0 %vm1019_vm6, %v882_v62  ;;  %vm4696_vm7 = vcmp.eq.s32.totalorder %v2192_v4, %v2194_v6 }
  0xd2   : > { %4162 = vmatpush3.xpose.msk.msra.mxu1 %vm1019_vm6, %v996_v8  ;;  %4167 = vmatpush3.xpose.msk.msra.mxu0 %vm1019_vm6, %v1010_v3 }
  0xd3   : > { %4163 = vmatprep.mubr.msk.f32.mxu1 %vm4440_vm1, %v4439_v27  ;;  %4168 = vmatprep.mubr.msk.f32.mxu0 %vm4440_vm1, %v4439_v27  ;;  %v4700_v9 = vpop.permute.xlu1 %2221 }
  0xd4   : > { %4171 = vmatprep.subr.mxu1 %v4439_v27  ;;  %4176 = vmatprep.subr.mxu0 %v4439_v27  ;;  %vm2272_vm10 = vcmp.eq.s32.totalorder %v4700_v9, %v4011_v47 }
  0xd5   : > { %4164 = vmatmul.mubr.msk.f32.vlgmr.msra.gmra.mxu1 %vm1019_vm6, %v883_v17  ;;  %4169 = vmatmul.mubr.msk.f32.vlgmr.msra.gmra.mxu0 %vm1019_vm6, %v876_v49 }
  0xd6   : > { %4172 = vmatpush3.xpose.msk.msra.mxu1 %vm1019_vm6, %v982_v44  ;;  %4177 = vmatpush3.xpose.msk.msra.mxu0 %vm1019_vm6, %v984_v52  ;;  %v4010_v44 = vld [vmem:[%s4745_s10] ss:$0 sm:$0xff] }
  0xd7   : > { %4173 = vmatprep.mubr.msk.f32.mxu1 %vm4440_vm1, %v4439_v27  ;;  %4178 = vmatprep.mubr.msk.f32.mxu0 %vm4440_vm1, %v4439_v27  ;;  %v4711_v19 = vpop.permute.xlu1 %2224  ;;  %vm2271_vm11 = vcmp.eq.s32.totalorder %v2219_v48, %v4010_v44 }
  0xd8   : > { %4181 = vmatprep.subr.mxu1 %v4439_v27  ;;  %4186 = vmatprep.subr.mxu0 %v4439_v27 }
  0xd9   : > { %4174 = vmatmul.mubr.msk.f32.vlgmr.msra.gmra.mxu1 %vm1019_vm6, %v877_v55  ;;  %4179 = vmatmul.mubr.msk.f32.vlgmr.msra.gmra.mxu0 %vm1019_vm6, %v878_v54 }
  0xda   : > { %4182 = vmatpush3.xpose.msk.msra.mxu1 %vm1019_vm6, %v986_v50  ;;  %4187 = vmatpush3.xpose.msk.msra.mxu0 %vm1019_vm6, %v988_v56 }
  0xdb   : > { %4183 = vmatprep.mubr.msk.f32.mxu1 %vm4440_vm1, %v4439_v27  ;;  %4188 = vmatprep.mubr.msk.f32.mxu0 %vm4440_vm1, %v4439_v27  ;;  %v2228_v37 = vpop.permute.xlu1 %2227 }
  0xdc   : > { %4191 = vmatprep.subr.mxu1 %v4439_v27  ;;  %4196 = vmatprep.subr.mxu0 %v4439_v27 }
  0xdd   : > { %4184 = vmatmul.mubr.msk.f32.vlgmr.msra.gmra.mxu1 %vm1019_vm6, %v879_v5  ;;  %4189 = vmatmul.mubr.msk.f32.vlgmr.msra.gmra.mxu0 %vm1019_vm6, %v880_v58  ;;  %v4012_v5 = vld [vmem:[%s4745_s10 + $0x2] ss:$0 sm:$0xff]  ;;  %v4013_v58 = vld [vmem:[%s4745_s10 + $0x3] ss:$0 sm:$0xff] }
  0xde   : > { %4192 = vmatpush3.xpose.msk.msra.mxu1 %vm1019_vm6, %v990_v0  ;;  %4197 = vmatpush3.xpose.msk.msra.mxu0 %vm1019_vm6, %v992_v2  ;;  %vm2273_vm12 = vcmp.eq.s32.totalorder %v4711_v19, %v4012_v5  ;;  %vm2274_vm13 = vcmp.eq.s32.totalorder %v2228_v37, %v4013_v58 }
  0xdf   : > { %4193 = vmatprep.mubr.msk.f32.mxu1 %vm4440_vm1, %v4439_v27  ;;  %4198 = vmatprep.mubr.msk.f32.mxu0 %vm4440_vm1, %v4439_v27  ;;  %v2231_v52 = vpop.permute.xlu1 %2230 }
  0xe0   : > { %4201 = vmatprep.subr.mxu1 %v4439_v27  ;;  %4206 = vmatprep.subr.mxu0 %v4439_v27 }
  0xe1   : > { %4194 = vmatmul.mubr.msk.f32.vlgmr.msra.gmra.mxu1 %vm1019_vm6, %v881_v61  ;;  %4199 = vmatmul.mubr.msk.f32.vlgmr.msra.gmra.mxu0 %vm1019_vm6, %v882_v62 }
  0xe2   : > { %4202 = vmatpush3.xpose.msk.msra.mxu1 %vm1019_vm6, %v994_v11  ;;  %4203 = vmatprep.mubr.msk.f32.mxu1 %vm4440_vm1, %v4439_v27 }
  0xe3   : > { %4208 = vmatprep.mubr.msk.f32.mxu0 %vm4440_vm1, %v4439_v27  ;;  %4211 = vmatprep.subr.mxu1 %v4439_v27  ;;  %v2234_v63 = vpop.permute.xlu1 %2233 }
  0xe4   : > { %vm2276_vm15 = vcmp.eq.s32.totalorder %v2234_v63, %v4015_v16 }
  0xe5   : > { %4204 = vmatmul.mubr.msk.f32.vlgmr.msra.gmra.mxu1 %vm1019_vm6, %v883_v17  ;;  %v4014_v17 = vld [vmem:[%s4745_s10 + $0x4] ss:$0 sm:$0xff] }
  0xe6   : > { %4213 = vmatprep.mubr.msk.f32.mxu1 %vm4440_vm1, %v4439_v27  ;;  %vm2275_vm14 = vcmp.eq.s32.totalorder %v2231_v52, %v4014_v17 }
 0x185   : > { %v1092_v10 = vpop.f32.mrf.mxu0 }
 0x186   : > { %v4704_v12 = vsel %vm4696_vm7, -100000.0, %v1092_v10 }
 0x187   : > { %v4130_v13 = vpop.f32.mrf.mxu0  ;;  %v2287_v14 = vsel %vm2286_vm8, %v4704_v12, -inf }
 0x188   : > { %2288 = vmax.xlane.f32.xlu1 %v2287_v14 }
 0x189   : > { %v1168_v15 = vpop.f32.mrf.mxu1  ;;  %v1244_v18 = vpop.f32.mrf.mxu0 }
 0x18a   : > { %v4715_v20 = vsel %vm4696_vm7, -100000.0, %v1168_v15  ;;  %v4719_v21 = vsel %vm4696_vm7, -100000.0, %v1244_v18  ;;  %v4016_v15 = vld [vmem:[%s4745_s10 + $0x6] ss:$0 sm:$0xff]  ;;  %v2237_v18 = vpop.permute.xlu1 %2236 }
 0x18b   : > { %v4135_v23 = vpop.f32.mrf.mxu1  ;;  %v4140_v24 = vpop.f32.mrf.mxu0  ;;  %v2290_v25 = vsel %vm2286_vm8, %v4715_v20, -inf  ;;  %v2293_v26 = vsel %vm2286_vm8, %v4719_v21, -inf  ;;  %vm2277_vm2 = vcmp.eq.s32.totalorder %v2237_v18, %v4016_v15 }
 0x18c   : > { %2291 = vmax.xlane.f32.xlu0 %v2290_v25  ;;  %2294 = vmax.xlane.f32.xlu1 %v2293_v26 }
 0x18d   : > { %v1320_v28 = vpop.f32.mrf.mxu1  ;;  %v1396_v29 = vpop.f32.mrf.mxu0 }
 0x18e   : > { %v4730_v30 = vsel %vm4696_vm7, -100000.0, %v1320_v28  ;;  %v4734_v31 = vsel %vm4696_vm7, -100000.0, %v1396_v29 }
 0x18f   : > { %v4145_v32 = vpop.f32.mrf.mxu1  ;;  %v4150_v33 = vpop.f32.mrf.mxu0  ;;  %v2296_v34 = vsel %vm2286_vm8, %v4730_v30, -inf  ;;  %v2299_v35 = vsel %vm2286_vm8, %v4734_v31, -inf }
 0x190   : > { %2297 = vmax.xlane.f32.xlu0 %v2296_v34  ;;  %2300 = vmax.xlane.f32.xlu1 %v2299_v35 }
 0x191   : > { %v1472_v38 = vpop.f32.mrf.mxu1  ;;  %v1548_v39 = vpop.f32.mrf.mxu0 }
 0x192   : > { %v4749_v40 = vsel %vm4696_vm7, -100000.0, %v1472_v38  ;;  %v4753_v41 = vsel %vm4696_vm7, -100000.0, %v1548_v39 }
 0x193   : > { %v4155_v42 = vpop.f32.mrf.mxu1  ;;  %v4160_v43 = vpop.f32.mrf.mxu0  ;;  %v2302_v45 = vsel %vm2286_vm8, %v4749_v40, -inf  ;;  %v2305_v46 = vsel %vm2286_vm8, %v4753_v41, -inf }
 0x194   : > { %2303 = vmax.xlane.f32.xlu0 %v2302_v45  ;;  %2306 = vmax.xlane.f32.xlu1 %v2305_v46 }
 0x195   : > { %v1624_v49 = vpop.f32.mrf.mxu1  ;;  %v1697_v51 = vpop.f32.mrf.mxu0 }
 0x196   : > { %v4763_v50 = vsel %vm4696_vm7, -100000.0, %v1624_v49  ;;  %v4765_v53 = vsel %vm2270_vm9, -100000.0, %v1697_v51 }
 0x197   : > { %v4165_v54 = vpop.f32.mrf.mxu1  ;;  %v4170_v55 = vpop.f32.mrf.mxu0  ;;  %v2308_v1 = vsel %vm2286_vm8, %v4763_v50, -inf  ;;  %v2311_v56 = vsel %vm2286_vm8, %v4765_v53, -inf }
 0x198   : > { %2309 = vmax.xlane.f32.xlu0 %v2308_v1  ;;  %2312 = vmax.xlane.f32.xlu1 %v2311_v56 }
 0x199   : > { %v1767_v0 = vpop.f32.mrf.mxu1  ;;  %v1837_v57 = vpop.f32.mrf.mxu0 }
 0x19a   : > { %v4774_v59 = vsel %vm2271_vm11, -100000.0, %v1767_v0  ;;  %v4776_v2 = vsel %vm2272_vm10, -100000.0, %v1837_v57 }
 0x19b   : > { %v4175_v11 = vpop.f32.mrf.mxu1  ;;  %v4180_v60 = vpop.f32.mrf.mxu0  ;;  %v2314_v61 = vsel %vm2286_vm8, %v4774_v59, -inf  ;;  %v2317_v62 = vsel %vm2286_vm8, %v4776_v2, -inf }
 0x19c   : > { %2315 = vmax.xlane.f32.xlu0 %v2314_v61  ;;  %2318 = vmax.xlane.f32.xlu1 %v2317_v62 }
 0x19d   : > { %v1907_v3 = vpop.f32.mrf.mxu1  ;;  %v1977_v8 = vpop.f32.mrf.mxu0 }
 0x19e   : > { %v4785_v22 = vsel %vm2273_vm12, -100000.0, %v1907_v3  ;;  %v4787_v4 = vsel %vm2274_vm13, -100000.0, %v1977_v8 }
 0x19f   : > { %v4185_v6 = vpop.f32.mrf.mxu1  ;;  %v4190_v7 = vpop.f32.mrf.mxu0  ;;  %v2320_v9 = vsel %vm2286_vm8, %v4785_v22, -inf  ;;  %v2323_v10 = vsel %vm2286_vm8, %v4787_v4, -inf }
 0x1a0   : > { %2321 = vmax.xlane.f32.xlu0 %v2320_v9  ;;  %2324 = vmax.xlane.f32.xlu1 %v2323_v10 }
 0x1a1   : > { %v2047_v13 = vpop.f32.mrf.mxu1  ;;  %v2117_v14 = vpop.f32.mrf.mxu0 }
 0x1a2   : > { %v4794_v19 = vsel %vm2275_vm14, -100000.0, %v2047_v13  ;;  %v4796_v23 = vsel %vm2276_vm15, -100000.0, %v2117_v14 }
 0x1a3   : > { %v4195_v24 = vpop.f32.mrf.mxu1  ;;  %v2326_v25 = vsel %vm2286_vm8, %v4794_v19, -inf  ;;  %v2329_v26 = vsel %vm2286_vm8, %v4796_v23, -inf  ;;  %v4200_v28 = vpop.f32.mrf.mxu0 }
 0x1a4   : > { %2327 = vmax.xlane.f32.xlu0 %v2326_v25  ;;  %2330 = vmax.xlane.f32.xlu1 %v2329_v26 }
 0x1a5   : > { %v2187_v29 = vpop.f32.mrf.mxu1 }
 0x1a6   : > { %v4802_v32 = vsel %vm2277_vm2, -100000.0, %v2187_v29 }
 0x1a7   : > { %v2332_v33 = vsel %vm2286_vm8, %v4802_v32, -inf  ;;  %v4205_v34 = vpop.f32.mrf.mxu1 }
 0x1a8   : > { %2333 = vmax.xlane.f32.xlu0 %v2332_v33 }
 0x211   : > { %v2289_v35 = vpop.xlane.xlu1 %2288 }
 0x215   : > { %v2292_v36 = vpop.xlane.xlu0 %2291  ;;  %v2295_v37 = vpop.xlane.xlu1 %2294 }
 0x219   : > { %v2298_v38 = vpop.xlane.xlu0 %2297  ;;  %v2301_v39 = vpop.xlane.xlu1 %2300 }
 0x21d   : > { %v2304_v42 = vpop.xlane.xlu0 %2303  ;;  %v2307_v43 = vpop.xlane.xlu1 %2306 }
 0x221   : > { %v2310_v45 = vpop.xlane.xlu0 %2309  ;;  %v2313_v46 = vpop.xlane.xlu1 %2312 }
 0x222   : > { %v4806_v47 = vmax.f32 %v2289_v35, %v2313_v46 }
 0x224   : > { %v2343_v44 = vsub.f32 %v4704_v12, %v4806_v47  ;;  %v2367_v48 = vsub.f32 %v4765_v53, %v4806_v47 }
 0x225   : > { %v2316_v49 = vpop.xlane.xlu0 %2315  ;;  %v2319_v51 = vpop.xlane.xlu1 %2318 }
 0x226   : > { %v2351_v52 = vmul.f32 1.442695, %v2343_v44  ;;  %v2375_v54 = vmul.f32 1.442695, %v2367_v48  ;;  %v4812_v55 = vmax.f32 %v2292_v36, %v2316_v49  ;;  %v4814_v1 = vmax.f32 %v2295_v37, %v2319_v51 }
 0x228   : > { %4351 = vpow2.f32 %v2351_v52  ;;  %v2344_v56 = vsub.f32 %v4715_v20, %v4812_v55  ;;  %v2368_v0 = vsub.f32 %v4774_v59, %v4812_v55  ;;  %v2345_v12 = vsub.f32 %v4719_v21, %v4814_v1 }
 0x229   : > { %4353 = vpow2.f32 %v2375_v54  ;;  %v2369_v53 = vsub.f32 %v4776_v2, %v4814_v1  ;;  %v2322_v57 = vpop.xlane.xlu0 %2321  ;;  %v2325_v5 = vpop.xlane.xlu1 %2324 }
 0x22a   : > { %v2353_v58 = vmul.f32 1.442695, %v2344_v56  ;;  %v2377_v11 = vmul.f32 1.442695, %v2368_v0  ;;  %v2355_v60 = vmul.f32 1.442695, %v2345_v12  ;;  %v4824_v61 = vmax.f32 %v2298_v38, %v2322_v57 }
 0x22b   : > { %v4826_v62 = vmax.f32 %v2301_v39, %v2325_v5  ;;  %v2379_v59 = vmul.f32 1.442695, %v2369_v53 }
 0x22c   : > { %4355 = vpow2.f32 %v2353_v58  ;;  %v2346_v20 = vsub.f32 %v4730_v30, %v4824_v61  ;;  %v2370_v21 = vsub.f32 %v4785_v22, %v4824_v61 }
 0x22d   : > { %4357 = vpow2.f32 %v2377_v11  ;;  %v2328_v63 = vpop.xlane.xlu0 %2327  ;;  %v2347_v3 = vsub.f32 %v4734_v31, %v4826_v62  ;;  %v2331_v17 = vpop.xlane.xlu1 %2330  ;;  %v2371_v6 = vsub.f32 %v4787_v4, %v4826_v62 }
 0x22e   : > { %4359 = vpow2.f32 %v2355_v60  ;;  %v2357_v2 = vmul.f32 1.442695, %v2346_v20  ;;  %v4834_v8 = vmax.f32 %v2304_v42, %v2328_v63  ;;  %v2381_v16 = vmul.f32 1.442695, %v2370_v21  ;;  %v4932_v21 = vld [vmem:[%s4929_s16] sm:$0xf] }
 0x22f   : > { %4361 = vpow2.f32 %v2379_v59  ;;  %v4838_v30 = vmax.f32 %v2307_v43, %v2331_v17  ;;  %v2359_v7 = vmul.f32 1.442695, %v2347_v3  ;;  %v2383_v31 = vmul.f32 1.442695, %v2371_v6  ;;  %v875_v59 = vld [vmem:[%s769_s12] sm:$0xf]  ;;  %4212 = vmatpush3.msk.msra.mxu1 %vm2483_vm3, %v4932_v21 }
 0x230   : > { %4363 = vpow2.f32 %v2357_v2  ;;  %v2348_v22 = vsub.f32 %v4749_v40, %v4834_v8  ;;  %v2372_v13 = vsub.f32 %v4794_v19, %v4834_v8  ;;  %4207 = vmatpush3.msk.msra.mxu0 %vm2483_vm3, %v875_v59  ;;  %4221 = vmatprep.subr.mxu1 %v4439_v27 }
 0x231   : > { %v2334_v9 = vpop.xlane.xlu0 %2333  ;;  %4365 = vpow2.f32 %v2381_v16  ;;  %v2349_v14 = vsub.f32 %v4753_v41, %v4838_v30  ;;  %v2373_v19 = vsub.f32 %v4796_v23, %v4838_v30  ;;  %4216 = vmatprep.subr.mxu0 %v4439_v27 }
 0x232   : > { %4367 = vpow2.f32 %v2359_v7  ;;  %v2361_v4 = vmul.f32 1.442695, %v2348_v22  ;;  %v4850_v18 = vmax.f32 %v2310_v45, %v2334_v9  ;;  %v2385_v25 = vmul.f32 1.442695, %v2372_v13 }
 0x233   : > { %4369 = vpow2.f32 %v2383_v31  ;;  %v2363_v26 = vmul.f32 1.442695, %v2349_v14  ;;  %v2387_v35 = vmul.f32 1.442695, %v2373_v19 }
 0x234   : > { %4371 = vpow2.f32 %v2361_v4  ;;  %v2350_v41 = vsub.f32 %v4763_v50, %v4850_v18  ;;  %v2374_v23 = vsub.f32 %v4802_v32, %v4850_v18 }
 0x235   : > { %v4842_v10 = vpop.eup %4351  ;;  %4373 = vpow2.f32 %v2385_v25 }
 0x236   : > { %v4848_v15 = vpop.eup %4353  ;;  %v2391_v40 = vsel %vm2286_vm8, %v4842_v10, 0.0  ;;  %4375 = vpow2.f32 %v2363_v26  ;;  %v2365_v37 = vmul.f32 1.442695, %v2350_v41  ;;  %v2389_v43 = vmul.f32 1.442695, %v2374_v23 }
 0x237   : > { %2392 = vadd.xlane.f32.xlu1 %v2391_v40  ;;  %v2415_v33 = vsel %vm2286_vm8, %v4848_v15, 0.0  ;;  %4377 = vpow2.f32 %v2387_v35 }
 0x238   : > { %4379 = vpow2.f32 %v2365_v37 }
 0x239   : > { %v4854_v24 = vpop.eup %4355  ;;  %4381 = vpow2.f32 %v2389_v43 }
 0x23a   : > { %v4858_v28 = vpop.eup %4357  ;;  %v2394_v29 = vsel %vm2286_vm8, %v4854_v24, 0.0 }
 0x23b   : > { %v4866_v34 = vpop.eup %4359  ;;  %2395 = vadd.xlane.f32.xlu0 %v2394_v29  ;;  %2416 = vadd.xlane.f32.xlu1 %v2415_v33  ;;  %v2418_v50 = vsel %vm2286_vm8, %v4858_v28, 0.0  ;;  %v4942_v33 = vld [vmem:[%s4929_s16 + $0x4] sm:$0xf] }
 0x23c   : > { %v4870_v36 = vpop.eup %4361  ;;  %v2397_v38 = vsel %vm2286_vm8, %v4866_v34, 0.0 }
 0x23d   : > { %v4876_v39 = vpop.eup %4363  ;;  %v2421_v45 = vsel %vm2286_vm8, %v4870_v36, 0.0 }
 0x23e   : > { %v4878_v42 = vpop.eup %4365  ;;  %v2400_v32 = vsel %vm2286_vm8, %v4876_v39, 0.0 }
 0x23f   : > { %2419 = vadd.xlane.f32.xlu0 %v2418_v50  ;;  %2398 = vadd.xlane.f32.xlu1 %v2397_v38  ;;  %v4884_v46 = vpop.eup %4367  ;;  %v2424_v48 = vsel %vm2286_vm8, %v4878_v42, 0.0 }
 0x240   : > { %v4886_v44 = vpop.eup %4369  ;;  %v2403_v49 = vsel %vm2286_vm8, %v4884_v46, 0.0 }
 0x241   : > { %v4892_v51 = vpop.eup %4371  ;;  %v2427_v56 = vsel %vm2286_vm8, %v4886_v44, 0.0 }
 0x242   : > { %v4894_v52 = vpop.eup %4373  ;;  %v2406_v54 = vsel %vm2286_vm8, %v4892_v51, 0.0 }
 0x243   : > { %2401 = vadd.xlane.f32.xlu0 %v2400_v32  ;;  %2422 = vadd.xlane.f32.xlu1 %v2421_v45  ;;  %v4900_v0 = vpop.eup %4375  ;;  %v2430_v53 = vsel %vm2286_vm8, %v4894_v52, 0.0  ;;  %v4961_v45 = vld [vmem:[%s4929_s16 + $0x8] sm:$0xf] }
 0x244   : > { %v4902_v12 = vpop.eup %4377  ;;  %v2409_v57 = vsel %vm2286_vm8, %v4900_v0, 0.0 }
 0x245   : > { %v4908_v5 = vpop.eup %4379  ;;  %v2433_v11 = vsel %vm2286_vm8, %v4902_v12, 0.0 }
 0x246   : > { %v2412_v58 = vsel %vm2286_vm8, %v4908_v5, 0.0  ;;  %v4914_v60 = vpop.eup %4381 }
 0x247   : > { %2425 = vadd.xlane.f32.xlu0 %v2424_v48  ;;  %2404 = vadd.xlane.f32.xlu1 %v2403_v49  ;;  %v2436_v20 = vsel %vm2286_vm8, %v4914_v60, 0.0 }
 0x24b   : > { %2407 = vadd.xlane.f32.xlu0 %v2406_v54  ;;  %2428 = vadd.xlane.f32.xlu1 %v2427_v56 }
 0x24f   : > { %2431 = vadd.xlane.f32.xlu0 %v2430_v53  ;;  %2410 = vadd.xlane.f32.xlu1 %v2409_v57 }
 0x253   : > { %2413 = vadd.xlane.f32.xlu0 %v2412_v58  ;;  %2434 = vadd.xlane.f32.xlu1 %v2433_v11  ;;  %v4977_v58 = vld [vmem:[%s4929_s16 + $0xc] sm:$0xf] }
 0x257   : > { %2437 = vadd.xlane.f32.xlu0 %v2436_v20 }
 0x2c0   : > { %v2393_v63 = vpop.xlane.xlu1 %2392 }
 0x2c4   : > { %v2396_v2 = vpop.xlane.xlu0 %2395  ;;  %v2417_v3 = vpop.xlane.xlu1 %2416 }
 0x2c5   : > { %v2439_v17 = vadd.f32 %v2417_v3, %v2393_v63  ;;  %v4993_v3 = vld [vmem:[%s4929_s16 + $0x10] sm:$0xf] }
 0x2c7   : > { %4383 = vrcp.f32 %v2439_v17 }
 0x2c8   : > { %4385 = vlog2.f32 %v2439_v17  ;;  %v2420_v16 = vpop.xlane.xlu0 %2419  ;;  %v2399_v6 = vpop.xlane.xlu1 %2398 }
 0x2c9   : > { %v2440_v7 = vadd.f32 %v2420_v16, %v2396_v2 }
 0x2cb   : > { %4387 = vrcp.f32 %v2440_v7 }
 0x2cc   : > { %4389 = vlog2.f32 %v2440_v7  ;;  %v2402_v22 = vpop.xlane.xlu0 %2401  ;;  %v2423_v9 = vpop.xlane.xlu1 %2422  ;;  %v871_v7 = vld [vmem:[%s4929_s16 + $0x14] sm:$0xf] }
 0x2cd   : > { %v2441_v31 = vadd.f32 %v2423_v9, %v2399_v6 }
 0x2cf   : > { %4391 = vrcp.f32 %v2441_v31 }
 0x2d0   : > { %4393 = vlog2.f32 %v2441_v31  ;;  %v2426_v13 = vpop.xlane.xlu0 %2425  ;;  %v2405_v14 = vpop.xlane.xlu1 %2404 }
 0x2d1   : > { %v2442_v4 = vadd.f32 %v2426_v13, %v2402_v22  ;;  %v872_v13 = vld [vmem:[%s4929_s16 + $0x18] sm:$0xf] }
 0x2d3   : > { %4395 = vrcp.f32 %v2442_v4 }
 0x2d4   : > { %v4937_v40 = vpop.eup %4383  ;;  %4397 = vlog2.f32 %v2442_v4  ;;  %v2408_v25 = vpop.xlane.xlu0 %2407 }
 0x2d5   : > { %v2429_v26 = vpop.xlane.xlu1 %2428  ;;  %v4386_v19 = vpop.eup %4385  ;;  %v2471_v29 = vmul.f32 %v4937_v40, %v4848_v15 }
 0x2d6   : > { %v2443_v41 = vadd.f32 %v2429_v26, %v2405_v14  ;;  %v3685_v35 = vmul.f32 0.6931472, %v4386_v19 }
 0x2d7   : > { %4209 = vmatmul.mubr.msk.f32.vlgmr.msra.gmra.mxu0 %vm2479_vm4, %v2471_v29  ;;  %v2463_v29 = vmul.f32 %v4937_v40, %v4842_v10 }
 0x2d8   : > { %4399 = vrcp.f32 %v2443_v41  ;;  %v4951_v23 = vpop.eup %4387  ;;  %v3700_v37 = vadd.f32 %v3685_v35, %v4806_v47  ;;  %v2432_v15 = vpop.xlane.xlu0 %2431  ;;  %4217 = vmatpush3.msk.msra.mxu0 %vm2483_vm3, %v4942_v33  ;;  %4218 = vmatprep.mubr.msk.f32.mxu0 %vm4440_vm1, %v4439_v27 }
 0x2d9   : > { %4401 = vlog2.f32 %v2443_v41  ;;  %v2411_v50 = vpop.xlane.xlu1 %2410  ;;  %v4390_v38 = vpop.eup %4389  ;;  %v2444_v43 = vadd.f32 %v2432_v15, %v2408_v25  ;;  %v2472_v32 = vmul.f32 %v4951_v23, %v4858_v28  ;;  %4226 = vmatprep.subr.mxu0 %v4439_v27  ;;  %v2464_v10 = vmul.f32 %v4951_v23, %v4854_v24 }
 0x2da   : > { %3709 = vst.msk [vmem:[%s4948_s18] sm:$0xf] %vm3708_vm5, %v3700_v37  ;;  %v3687_v47 = vmul.f32 0.6931472, %v4390_v38 }
 0x2db   : > { %4403 = vrcp.f32 %v2444_v43  ;;  %4214 = vmatmul.mubr.msk.f32.vlgmr.msra.gmra.mxu1 %vm2479_vm4, %v2472_v32 }
 0x2dc   : > { %v4967_v48 = vpop.eup %4391  ;;  %v3701_v49 = vadd.f32 %v3687_v47, %v4812_v55  ;;  %4405 = vlog2.f32 %v2444_v43  ;;  %v2414_v54 = vpop.xlane.xlu0 %2413  ;;  %4222 = vmatpush3.msk.msra.mxu1 %vm2483_vm3, %v4961_v45  ;;  %4223 = vmatprep.mubr.msk.f32.mxu1 %vm4440_vm1, %v4439_v27 }
 0x2dd   : > { %v2435_v56 = vpop.xlane.xlu1 %2434  ;;  %v4394_v28 = vpop.eup %4393  ;;  %v2473_v57 = vmul.f32 %v4967_v48, %v4870_v36  ;;  %4231 = vmatprep.subr.mxu1 %v4439_v27 }
 0x2de   : > { %v2445_v53 = vadd.f32 %v2435_v56, %v2411_v50  ;;  %3710 = vst.msk [vmem:[%s4948_s18 + $0x4] sm:$0xf] %vm3708_vm5, %v3701_v49  ;;  %v3689_v55 = vmul.f32 0.6931472, %v4394_v28 }
 0x2df   : > { %4219 = vmatmul.mubr.msk.f32.vlgmr.msra.gmra.mxu0 %vm2479_vm4, %v2473_v57 }
 0x2e0   : > { %4407 = vrcp.f32 %v2445_v53  ;;  %v4983_v11 = vpop.eup %4395  ;;  %v3702_v20 = vadd.f32 %v3689_v55, %v4814_v1  ;;  %v2438_v59 = vpop.xlane.xlu0 %2437  ;;  %4227 = vmatpush3.msk.msra.mxu0 %vm2483_vm3, %v4977_v58  ;;  %4228 = vmatprep.mubr.msk.f32.mxu0 %vm4440_vm1, %v4439_v27 }
 0x2e1   : > { %4409 = vlog2.f32 %v2445_v53  ;;  %v4398_v36 = vpop.eup %4397  ;;  %v2446_v63 = vadd.f32 %v2438_v59, %v2414_v54  ;;  %v2474_v2 = vmul.f32 %v4983_v11, %v4878_v42  ;;  %4236 = vmatprep.subr.mxu0 %v4439_v27 }
 0x2e2   : > { %3711 = vst.msk [vmem:[%s4948_s18 + $0x8] sm:$0xf] %vm3708_vm5, %v3702_v20  ;;  %v3691_v1 = vmul.f32 0.6931472, %v4398_v36 }
 0x2e3   : > { %4411 = vrcp.f32 %v2446_v63  ;;  %4224 = vmatmul.mubr.msk.f32.vlgmr.msra.gmra.mxu1 %vm2479_vm4, %v2474_v2 }
 0x2e4   : > { %v3703_v16 = vadd.f32 %v3691_v1, %v4824_v61  ;;  %4413 = vlog2.f32 %v2446_v63  ;;  %4232 = vmatpush3.msk.msra.mxu1 %vm2483_vm3, %v4993_v3  ;;  %4233 = vmatprep.mubr.msk.f32.mxu1 %vm4440_vm1, %v4439_v27 }
 0x2e5   : > { %v4400_v17 = vpop.eup %4399  ;;  %4241 = vmatprep.subr.mxu1 %v4439_v27 }
 0x2e6   : > { %v4402_v42 = vpop.eup %4401  ;;  %v2475_v6 = vmul.f32 %v4400_v17, %v4886_v44  ;;  %3712 = vst.msk [vmem:[%s4948_s18 + $0xc] sm:$0xf] %vm3708_vm5, %v3703_v16  ;;  %v2467_v24 = vmul.f32 %v4400_v17, %v4884_v46  ;;  %v873_v46 = vld [vmem:[%s4929_s16 + $0x1c] sm:$0xf] }
 0x2e7   : > { %v3693_v22 = vmul.f32 0.6931472, %v4402_v42 }
 0x2e8   : > { %4229 = vmatmul.mubr.msk.f32.vlgmr.msra.gmra.mxu0 %vm2479_vm4, %v2475_v6  ;;  %v4404_v61 = vpop.eup %4403 }
 0x2e9   : > { %v3704_v9 = vadd.f32 %v3693_v22, %v4826_v62  ;;  %4237 = vmatpush3.msk.msra.mxu0 %vm2483_vm3, %v871_v7  ;;  %4238 = vmatprep.mubr.msk.f32.mxu0 %vm4440_vm1, %v4439_v27  ;;  %v4406_v31 = vpop.eup %4405  ;;  %v2476_v44 = vmul.f32 %v4404_v61, %v4894_v52 }
 0x2ea   : > { %4246 = vmatprep.subr.mxu0 %v4439_v27  ;;  %v3695_v14 = vmul.f32 0.6931472, %v4406_v31 }
 0x2eb   : > { %3713 = vst.msk [vmem:[%s4948_s18 + $0x10] sm:$0xf] %vm3708_vm5, %v3704_v9  ;;  %4234 = vmatmul.mubr.msk.f32.vlgmr.msra.gmra.mxu1 %vm2479_vm4, %v2476_v44 }
 0x2ec   : > { %v3705_v62 = vadd.f32 %v3695_v14, %v4834_v8  ;;  %4242 = vmatpush3.msk.msra.mxu1 %vm2483_vm3, %v872_v13  ;;  %4243 = vmatprep.mubr.msk.f32.mxu1 %vm4440_vm1, %v4439_v27 }
 0x2ed   : > { %v4408_v4 = vpop.eup %4407  ;;  %4251 = vmatprep.subr.mxu1 %v4439_v27 }
 0x2ee   : > { %v4410_v25 = vpop.eup %4409  ;;  %v2477_v52 = vmul.f32 %v4408_v4, %v4902_v12  ;;  %3714 = vst.msk [vmem:[%s4948_s18 + $0x14] sm:$0xf] %vm3708_vm5, %v3705_v62 }
 0x2ef   : > { %v3697_v26 = vmul.f32 0.6931472, %v4410_v25 }
 0x2f0   : > { %4239 = vmatmul.mubr.msk.f32.vlgmr.msra.gmra.mxu0 %vm2479_vm4, %v2477_v52  ;;  %v4412_v19 = vpop.eup %4411 }
 0x2f1   : > { %v3706_v41 = vadd.f32 %v3697_v26, %v4838_v30  ;;  %4247 = vmatpush3.msk.msra.mxu0 %vm2483_vm3, %v4932_v21  ;;  %4248 = vmatprep.mubr.msk.f32.mxu0 %vm4440_vm1, %v4439_v27  ;;  %v4414_v8 = vpop.eup %4413  ;;  %v2478_v12 = vmul.f32 %v4412_v19, %v4914_v60  ;;  %v2465_v60 = vmul.f32 %v4967_v48, %v4866_v34 }
 0x2f2   : > { %4256 = vmatprep.subr.mxu0 %v4439_v27  ;;  %v3699_v35 = vmul.f32 0.6931472, %v4414_v8  ;;  %v2468_v34 = vmul.f32 %v4404_v61, %v4892_v51  ;;  %v2470_v21 = vmul.f32 %v4412_v19, %v4908_v5 }
 0x2f3   : > { %3715 = vst.msk [vmem:[%s4948_s18 + $0x18] sm:$0xf] %vm3708_vm5, %v3706_v41  ;;  %4244 = vmatmul.mubr.msk.f32.vlgmr.msra.gmra.mxu1 %vm2479_vm4, %v2478_v12 }
 0x2f4   : > { %4249 = vmatmul.mubr.msk.f32.vlgmr.msra.gmra.mxu0 %vm2479_vm4, %v2463_v29  ;;  %v3707_v30 = vadd.f32 %v3699_v35, %v4850_v18  ;;  %4252 = vmatpush3.msk.msra.mxu1 %vm2483_vm3, %v4942_v33  ;;  %v2466_v18 = vmul.f32 %v4983_v11, %v4876_v39  ;;  %v2469_v39 = vmul.f32 %v4408_v4, %v4900_v0 }
 0x2f5   : > { %4253 = vmatprep.mubr.msk.f32.mxu1 %vm4440_vm1, %v4439_v27  ;;  %4257 = vmatpush3.msk.msra.mxu0 %vm2483_vm3, %v4961_v45 }
 0x2f6   : > { %4258 = vmatprep.mubr.msk.f32.mxu0 %vm4440_vm1, %v4439_v27  ;;  %3716 = vst.msk [vmem:[%s4948_s18 + $0x1c] sm:$0xf] %vm3708_vm5, %v3707_v30  ;;  %4261 = vmatprep.subr.mxu1 %v4439_v27 }
 0x2f7   : > { %4266 = vmatprep.subr.mxu0 %v4439_v27  ;;  %4254 = vmatmul.mubr.msk.f32.vlgmr.msra.gmra.mxu1 %vm2479_vm4, %v2464_v10 }
 0x2f8   : > { %4259 = vmatmul.mubr.msk.f32.vlgmr.msra.gmra.mxu0 %vm2479_vm4, %v2465_v60  ;;  %4262 = vmatpush3.msk.msra.mxu1 %vm2483_vm3, %v4977_v58 }
 0x2f9   : > { %4263 = vmatprep.mubr.msk.f32.mxu1 %vm4440_vm1, %v4439_v27  ;;  %4267 = vmatpush3.msk.msra.mxu0 %vm2483_vm3, %v4993_v3 }
 0x2fa   : > { %4268 = vmatprep.mubr.msk.f32.mxu0 %vm4440_vm1, %v4439_v27  ;;  %4271 = vmatprep.subr.mxu1 %v4439_v27 }
 0x2fb   : > { %4276 = vmatprep.subr.mxu0 %v4439_v27  ;;  %4264 = vmatmul.mubr.msk.f32.vlgmr.msra.gmra.mxu1 %vm2479_vm4, %v2466_v18 }
 0x2fc   : > { %4269 = vmatmul.mubr.msk.f32.vlgmr.msra.gmra.mxu0 %vm2479_vm4, %v2467_v24  ;;  %4272 = vmatpush3.msk.msra.mxu1 %vm2483_vm3, %v871_v7 }
 0x2fd   : > { %4273 = vmatprep.mubr.msk.f32.mxu1 %vm4440_vm1, %v4439_v27  ;;  %4277 = vmatpush3.msk.msra.mxu0 %vm2483_vm3, %v872_v13 }
 0x2fe   : > { %4278 = vmatprep.mubr.msk.f32.mxu0 %vm4440_vm1, %v4439_v27  ;;  %4281 = vmatprep.subr.mxu1 %v4439_v27 }
 0x2ff   : > { %4274 = vmatmul.mubr.msk.f32.vlgmr.msra.gmra.mxu1 %vm2479_vm4, %v2468_v34 }
 0x300   : > { %4279 = vmatmul.mubr.msk.f32.vlgmr.msra.gmra.mxu0 %vm2479_vm4, %v2469_v39  ;;  %4282 = vmatpush3.msk.msra.mxu1 %vm2483_vm3, %v873_v46 }
 0x301   : > { %4283 = vmatprep.mubr.msk.f32.mxu1 %vm4440_vm1, %v4439_v27 }
 0x303   : > { %4284 = vmatmul.mubr.msk.f32.vlgmr.msra.gmra.mxu1 %vm2479_vm4, %v2470_v21 }
 0x397   : > { %v2553_v51 = vpop.f32.mrf.mxu0 }
 0x399   : > { %v4210_v40 = vpop.f32.mrf.mxu0 }
 0x39b   : > { %v2629_v0 = vpop.f32.mrf.mxu1 }
 0x39d   : > { %v4215_v33 = vpop.f32.mrf.mxu1 }
 0x39f   : > { %v2705_v23 = vpop.f32.mrf.mxu0 }
 0x3a1   : > { %v4220_v37 = vpop.f32.mrf.mxu0 }
 0x3a3   : > { %v2781_v15 = vpop.f32.mrf.mxu1 }
 0x3a5   : > { %v4225_v50 = vpop.f32.mrf.mxu1 }
 0x3a8   : > { %v2857_v38 = vpop.f32.mrf.mxu0 }
 0x3aa   : > { %v4230_v43 = vpop.f32.mrf.mxu0 }
 0x3ab   : > { %v2933_v32 = vpop.f32.mrf.mxu1 }
 0x3ad   : > { %v4235_v45 = vpop.f32.mrf.mxu1 }
 0x3b0   : > { %v3009_v47 = vpop.f32.mrf.mxu0 }
 0x3b2   : > { %v4240_v48 = vpop.f32.mrf.mxu0 }
 0x3b3   : > { %v3085_v27 = vpop.f32.mrf.mxu1 }
 0x3b4   : > { %v3158_v5 = vpop.f32.mrf.mxu0 }
 0x3b5   : > { %v3159_v49 = vadd.f32 %v3158_v5, %v2553_v51  ;;  %v4245_v54 = vpop.f32.mrf.mxu1 }
 0x3b6   : > { %v4250_v56 = vpop.f32.mrf.mxu0 }
 0x3b7   : > { %3676 = vst.msk [vmem:[%s5097_s21] sm:$0xf] %vm892_vm0, %v3159_v49  ;;  %v3231_v28 = vpop.f32.mrf.mxu1 }
 0x3b8   : > { %v3304_v53 = vpop.f32.mrf.mxu0  ;;  %v3232_v57 = vadd.f32 %v3231_v28, %v2629_v0 }
 0x3b9   : > { %v3305_v58 = vadd.f32 %v3304_v53, %v2705_v23  ;;  %v4255_v55 = vpop.f32.mrf.mxu1 }
 0x3ba   : > { %v4260_v11 = vpop.f32.mrf.mxu0  ;;  %3677 = vst.msk [vmem:[%s5097_s21 + $0x4] sm:$0xf] %vm892_vm0, %v3232_v57 }
 0x3bb   : > { %3678 = vst.msk [vmem:[%s5097_s21 + $0x8] sm:$0xf] %vm892_vm0, %v3305_v58  ;;  %v3377_v20 = vpop.f32.mrf.mxu1 }
 0x3bc   : > { %v3450_v59 = vpop.f32.mrf.mxu0  ;;  %v3378_v36 = vadd.f32 %v3377_v20, %v2781_v15 }
 0x3bd   : > { %v3451_v63 = vadd.f32 %v3450_v59, %v2857_v38  ;;  %v4265_v2 = vpop.f32.mrf.mxu1 }
 0x3be   : > { %v4270_v3 = vpop.f32.mrf.mxu0  ;;  %3679 = vst.msk [vmem:[%s5097_s21 + $0xc] sm:$0xf] %vm892_vm0, %v3378_v36 }
 0x3bf   : > { %3680 = vst.msk [vmem:[%s5097_s21 + $0x10] sm:$0xf] %vm892_vm0, %v3451_v63  ;;  %v3523_v1 = vpop.f32.mrf.mxu1 }
 0x3c0   : > { %v3596_v17 = vpop.f32.mrf.mxu0  ;;  %v3524_v16 = vadd.f32 %v3523_v1, %v2933_v32 }
 0x3c1   : > { %v3597_v42 = vadd.f32 %v3596_v17, %v3009_v47  ;;  %v4275_v6 = vpop.f32.mrf.mxu1 }
 0x3c2   : > { %v4280_v7 = vpop.f32.mrf.mxu0  ;;  %3681 = vst.msk [vmem:[%s5097_s21 + $0x14] sm:$0xf] %vm892_vm0, %v3524_v16 }
 0x3c3   : > { %3682 = vst.msk [vmem:[%s5097_s21 + $0x18] sm:$0xf] %vm892_vm0, %v3597_v42  ;;  %v3672_v22 = vpop.f32.mrf.mxu1 }
 0x3c4   : > { %v3673_v61 = vadd.f32 %v3672_v22, %v3085_v27 }
 0x3c5   : > { %v4285_v9 = vpop.f32.mrf.mxu1 }
 0x3c6   : > { %3683 = vst.msk [vmem:[%s5097_s21 + $0x1c] sm:$0xf] %vm892_vm0, %v3673_v61 }
 0x3c7 PF: > { %s19_s29 = sadd.s32 1, %s4437_s29   ;;  %s5135_s27 = smov %s4433_s28 }
 0x3c8   : > { %p16_p5 = scmp.ge.s32.totalorder %s19_s29, 10   ;;  %s5136_s28 = smov %s5138_s30 }
 0x3ca   :  { %18 = sbr.rel (!%p16_p5) target bundleno = 2 (0x2), region = 108 }

// kernel: lsh_self_attention.7
= control target key start
LH: loop header
LB: loop body
LE: loop exit
PB: predicated region body
PF: predicated region fallthrough
CT: control target
= control target key end

     0   :  { %s269_s0 = inlined_call_operand.vmem [shape: f32[32,32], index: 0, kind: input, shape index: {}]   ;;  %s270_s1 = inlined_call_operand.vmem [shape: f32[32,32], index: 1, kind: input, shape index: {}]   ;;  %s271_s2 = inlined_call_operand.vmem [shape: f32[1,32], index: 2, kind: input, shape index: {}]   ;;  %s272_s3 = inlined_call_operand.hbm [shape: f32[32,32], index: 3, kind: output, shape index: {}]  }
   0x1   :  { %v22_v0 = vld [vmem:[%s270_s1 + $0x18] sm:$0xff]  ;;  %v21_v1 = vld [vmem:[%s270_s1 + $0x10] sm:$0xff]  ;;  %v20_v2 = vld [vmem:[%s270_s1 + $0x8] sm:$0xff] }
   0x2   :  { %161 = vmatprep.subr.mxu0 %v22_v0  ;;  %175 = vmatprep.subr.mxu1 %v22_v0 }
   0x3   :  { %162 = vmatpush3.msra.mxu0 %v22_v0  ;;  %179 = vmatpush3.msra.mxu1 %v22_v0 }
   0x4   :  { %8 = vsyncpa [#allocation3], 0  ;;  %163 = vmatprep.subr.mxu0 %v21_v1  ;;  %176 = vmatprep.subr.mxu1 %v21_v1  ;;  %v19_v3 = vld [vmem:[%s270_s1] sm:$0xff]  ;;  %vm30_vm0 = vcmask 261120   ;;  %v17_v5 = vld [vmem:[%s269_s0 + $0x10] sm:$0xff]  ;;  %s208_s29 = smov [#allocation2]  }
   0x5   :  { %164 = vmatpush3.msra.mxu0 %v21_v1  ;;  %180 = vmatpush3.msra.mxu1 %v21_v1  ;;  %v15_v4 = vld [vmem:[%s269_s0] sm:$0xff]  ;;  %v16_v6 = vld [vmem:[%s269_s0 + $0x8] sm:$0xff]  ;;  %v18_v7 = vld [vmem:[%s269_s0 + $0x18] sm:$0xff]  ;;  %s137_s30 = sshll.u32 %s208_s29, 4  ;;  %s138_s30 = int_to_ptr.vmem [resolvable:$true] %s137_s30 }
   0x6   :  { %165 = vmatprep.subr.mxu0 %v20_v2  ;;  %177 = vmatprep.subr.mxu1 %v20_v2  ;;  %v148_v8 = vld [vmem:[%s271_s2] ss:$0 sm:$0xff]  ;;  %s186_s0 = scalar_lea.vmem %s138_s30, 512  ;;  %p191_p1 = scmp.lt.s32.totalorder %s138_s30, %s138_s30 }
   0x7   :  { %166 = vmatpush3.msra.mxu0 %v20_v2  ;;  %181 = vmatpush3.msra.mxu1 %v20_v2  ;;  %p187_p0 = scmp.ne.s32.totalorder %s138_s30, %s186_s0  ;;  %p192_p2 = scmp.lt.s32.totalorder %s186_s0, %s186_s0 }
   0x8   :  { %167 = vmatprep.subr.mxu0 %v19_v3  ;;  %178 = vmatprep.subr.mxu1 %v19_v3 }
   0x9   :  { %168 = vmatpush3.msra.mxu0 %v19_v3  ;;  %182 = vmatpush3.msra.mxu1 %v19_v3  ;;  %p193_p3 = por %p192_p2, %p191_p1 }
   0xa   :  { %169 = vmatprep.mubr.msk.f32.mxu0 %vm30_vm0, %v15_v4  ;;  %172 = vmatprep.mubr.msk.f32.mxu1 %vm30_vm0, %v17_v5 }
   0xb   :  { %170 = vmatmul.mubr.msk.f32.vlgmr.msra.gmra.mxu0 %vm30_vm0, %v16_v6  ;;  %173 = vmatmul.mubr.msk.f32.vlgmr.msra.gmra.mxu1 %vm30_vm0, %v18_v7  ;;  %p194_p4 = pnand %p193_p3, %p187_p0 }
  0xcb   :  { %v171_v9 = vpop.f32.mrf.mxu0  ;;  %v174_v10 = vpop.f32.mrf.mxu1 }
  0xcc   :  { %v115_v11 = vadd.f32 %v171_v9, %v148_v8  ;;  %v125_v12 = vadd.f32 %v174_v10, %v148_v8 }
  0xcd   :  { %v109_v13 = vpop.f32.mrf.mxu0  ;;  %v119_v14 = vpop.f32.mrf.mxu1 }
  0xce   :  { %129 = vst.msk [vmem:[#allocation2 + $0x8] sm:$0xff] %vm30_vm0, %v115_v11  ;;  %131 = vst.msk [vmem:[#allocation2 + $0x18] sm:$0xff] %vm30_vm0, %v125_v12  ;;  %v110_v15 = vadd.f32 %v148_v8, %v109_v13  ;;  %v120_v16 = vadd.f32 %v148_v8, %v119_v14 }
  0xd0   :  { %128 = vst.msk [vmem:[#allocation2] sm:$0xff] %vm30_vm0, %v110_v15  ;;  %130 = vst.msk [vmem:[#allocation2 + $0x10] sm:$0xff] %vm30_vm0, %v120_v16 }
  0xd1   :  { %197 = shalt.err (!%p194_p4)
}
  0xd2   :  { %s209_s2 = smov 128   ;;  %s210_s4 = smov 8  }
  0xd3   :  { %143 = dma.vmem_to_hbm [thread:$0]  %s138_s30, 512, %s272_s3, [#allocation3], %s209_s2, %s209_s2, %s210_s4  }
  0xd4   :  { %206 = dma.done.wait [#allocation3], 512  }
  0xd5   :  { %207 = vsyncadd [#allocation3], 4294966784 }
  0xd6   :  { %147 = vsyncpa [#allocation3], 1 }

</bundles_post_ra>
